<compile_context>
chip_gen: v5e
topology: v5e:2x2
jax: 0.10.0
libtpu: 0.0.40
codegen_flags: <defaults>
</compile_context>

<pallas_src>
import jax
import jax.numpy as jnp
from jax.experimental import pallas as pl
from jax.experimental.pallas import tpu as pltpu

NULL_ATTENTION = float(-(2 ** 10))  # -1024.0, as in the PyTorch module


def _round_up(x, m):
    return (x + m - 1) // m * m


def _hist_att_kernel(x_ref, uh_ref, len_ref,
                     w1x_ref, w1h_ref, w1xh_ref, b1_ref,
                     w2_ref, b2_ref, w3_ref, b3_ref,
                     rep_ref, score_ref):
    TB, L, D = uh_ref.shape
    H1 = w1x_ref.shape[1]
    H2 = w2_ref.shape[1]
    mmdt = w1h_ref.dtype                                # bf16 matmul operand dtype

    x_f = x_ref[...].astype(jnp.float32)                # (TB, D)   f32
    uh = uh_ref[...]                                    # (TB, L, D) bf16 (halved DMA)
    uh_f = uh.astype(jnp.float32)                       # f32 copy for VPU math

    # Elementwise x*h in f32 (v5e has no bf16 VPU); only dot operands are bf16.
    xh_f = x_f[:, None, :] * uh_f                       # (TB, L, D)

    uh2 = uh.reshape(TB * L, D)                         # bf16
    xh2 = xh_f.reshape(TB * L, D).astype(mmdt)          # bf16

    def mm(a, w):
        return jnp.dot(a, w, preferred_element_type=jnp.float32)

    # ----- Layer 1 (folded): two big K=32 matmuls + one tiny per-batch term.
    hx = mm(x_f.astype(mmdt), w1x_ref[...])             # (TB, H1)
    h1 = mm(uh2, w1h_ref[...]) + mm(xh2, w1xh_ref[...]) # (TB*L, H1)
    h1 = h1.reshape(TB, L, H1) + hx[:, None, :] + b1_ref[...]
    # TODO(synk): Dropout(p=0.2) is stochastic/train-only; eval-mode identity here.
    h1 = jnp.maximum(h1, 0.0)                           # (TB, L, H1) f32

    # ----- Layer 2: K = 256 (padded) -> full MXU depth on v6e/v7x.
    h2 = mm(h1.reshape(TB * L, H1).astype(mmdt), w2_ref[...]) + b2_ref[...]
    h2 = jnp.maximum(h2, 0.0)                           # (TB*L, H2) f32

    # ----- Layer 3: Linear(H2 -> 1) as an f32 lane reduction (padded w3 tail = 0).
    s = jnp.sum(h2.reshape(TB, L, H2) * w3_ref[...], axis=-1) + b3_ref[...]   # (TB, L)

    # Mask positions >= hist_len (2-D, lane-dense: L on lanes).
    pos = jax.lax.broadcasted_iota(jnp.int32, (TB, L), 1)
    s = jnp.where(pos < len_ref[...], s, NULL_ATTENTION)
    score_ref[...] = s

    # Softmax over history (lanes); normalization via EUP reciprocal.
    m = jnp.max(s, axis=-1, keepdims=True)
    e = jnp.exp(s - m)
    att = e * pl.reciprocal(jnp.sum(e, axis=-1, keepdims=True), approx=True)  # (TB, L)
    rep_ref[...] = jnp.sum(uh_f * att[:, :, None], axis=1)                    # (TB, D)


def hist_att_forward(x_item, user_hist, hist_len, params, *, batch_tile=16):
    """Pallas forward of HistAtt. Returns (user_hist_rep, score)."""
    B, L, D = user_hist.shape
    w1, b1, w2, b2, w3, b3 = params
    H1 = w1.shape[1]
    H2 = w2.shape[1]
    assert w1.shape == (4 * D, H1)
    assert L % 8 == 0, "history length should be a multiple of 8 (sublane tiling)"

    # Batch tile: prefer >=16 (M = TB*L multiple of 256 for v6e/v7x MXU); fall
    # back to the largest divisor of B that keeps the block 8-aligned (or full).
    TB = min(batch_tile, B)
    while (B % TB) or (TB != B and TB % 8):
        TB -= 1
    grid = (B // TB,)

    H1p = _round_up(H1, 128)   # 200 -> 256
    H2p = _round_up(H2, 128)   # 80  -> 128
    f32, bf16 = jnp.float32, jnp.bfloat16

    # ---- Fold + pad the layer-1 weights once on the host/wrapper side.
    w1 = w1.astype(f32)
    w1a, w1b, w1c, w1d = (w1[0 * D:1 * D], w1[1 * D:2 * D],
                          w1[2 * D:3 * D], w1[3 * D:4 * D])

    def padlane(a, n):
        return jnp.pad(a, ((0, 0), (0, n - a.shape[1])))

    w1x = padlane(w1a + w1d, H1p).astype(bf16)     # x-term        (D, H1p)
    w1h = padlane(w1b - w1d, H1p).astype(bf16)     # hist-term     (D, H1p)
    w1xh = padlane(w1c, H1p).astype(bf16)          # (x*hist)-term (D, H1p)
    b1p = jnp.pad(b1.astype(f32), (0, H1p - H1)).reshape(1, H1p)

    w2p = jnp.pad(w2.astype(f32), ((0, H1p - H1), (0, H2p - H2))).astype(bf16)
    b2p = jnp.pad(b2.astype(f32), (0, H2p - H2)).reshape(1, H2p)
    w3p = jnp.pad(w3.astype(f32), (0, H2p - H2)).reshape(1, 1, H2p)
    b3p = jnp.asarray(b3, f32).reshape(1, 1)

    x32 = x_item.astype(f32)
    uhb = user_hist.astype(bf16)                   # dominant HBM input in bf16
    len2 = hist_len.reshape(B, 1).astype(jnp.int32)

    rep, score = pl.pallas_call(
        _hist_att_kernel,
        grid_spec=pltpu.PrefetchScalarGridSpec(
            num_scalar_prefetch=0,
            grid=grid,
            in_specs=[
                pl.BlockSpec((TB, D), lambda i: (i, 0)),          # x_item
                pl.BlockSpec((TB, L, D), lambda i: (i, 0, 0)),    # user_hist (bf16)
                pl.BlockSpec((TB, 1), lambda i: (i, 0)),          # hist_len (2-D)
                pl.BlockSpec((D, H1p), lambda i: (0, 0)),         # w1x (folded)
                pl.BlockSpec((D, H1p), lambda i: (0, 0)),         # w1h (folded)
                pl.BlockSpec((D, H1p), lambda i: (0, 0)),         # w1xh
                pl.BlockSpec((1, H1p), lambda i: (0, 0)),         # b1
                pl.BlockSpec((H1p, H2p), lambda i: (0, 0)),       # w2
                pl.BlockSpec((1, H2p), lambda i: (0, 0)),         # b2
                pl.BlockSpec((1, 1, H2p), lambda i: (0, 0, 0)),   # w3
                pl.BlockSpec((1, 1), lambda i: (0, 0)),           # b3
            ],
            out_specs=[
                pl.BlockSpec((TB, D), lambda i: (i, 0)),          # user_hist_rep
                pl.BlockSpec((TB, L), lambda i: (i, 0)),          # score (lane-dense)
            ],
        ),
        out_shape=(
            jax.ShapeDtypeStruct((B, D), f32),
            jax.ShapeDtypeStruct((B, L), f32),
        ),
        compiler_params=pltpu.CompilerParams(
            dimension_semantics=("parallel",),        # independent batch tiles
            vmem_limit_bytes=48 * 1024 * 1024,        # safe on v7x (64 MiB phys)
        ),
    )(x32, uhb, len2, w1x, w1h, w1xh, b1p, w2p, b2p, w3p, b3p)

    return rep, score


def hist_att_reference(x_item, user_hist, hist_len, params):
    """Pure-JAX f32 reference matching the PyTorch module (eval mode)."""
    w1, b1, w2, b2, w3, b3 = params
    B, L, D = user_hist.shape
    xt = jnp.broadcast_to(x_item[:, None, :], (B, L, D))
    inp = jnp.concatenate([xt, user_hist, xt * user_hist, xt - user_hist], axis=-1)
    h1 = jax.nn.relu(inp @ w1 + b1)
    h2 = jax.nn.relu(h1 @ w2 + b2)
    score = jnp.einsum("blh,h->bl", h2, w3) + b3
    mask = jnp.arange(L)[None, :] < hist_len[:, None]
    score = jnp.where(mask, score, NULL_ATTENTION)
    att = jax.nn.softmax(score, axis=1)
    rep = jnp.sum(user_hist * att[:, :, None], axis=1)
    return rep, score


if __name__ == "__main__":
    # Shapes consistent with the module: q_dim=32, history len 16; batch 64 so
    # the grid has multiple parallel steps (TB=16 -> grid=(4,)).
    B, L, q_dim = 64, 16, 32
    H1, H2 = 200, 80

    key = jax.random.PRNGKey(0)
    ks = jax.random.split(key, 8)
    x_item = jax.random.normal(ks[0], (B, q_dim), dtype=jnp.float32)
    user_hist = jax.random.normal(ks[1], (B, L, q_dim), dtype=jnp.float32)
    hist_len = jax.random.randint(ks[2], (B,), 1, L + 1, dtype=jnp.int32)

    # atten_net parameters, stored (in_dim, out_dim); Dropout has no params.
    w1 = 0.05 * jax.random.normal(ks[3], (4 * q_dim, H1), dtype=jnp.float32)
    b1 = 0.05 * jax.random.normal(ks[4], (H1,), dtype=jnp.float32)
    w2 = 0.05 * jax.random.normal(ks[5], (H1, H2), dtype=jnp.float32)
    b2 = 0.05 * jax.random.normal(ks[6], (H2,), dtype=jnp.float32)
    w3 = 0.05 * jax.random.normal(ks[7], (H2,), dtype=jnp.float32)
    b3 = jnp.zeros((), dtype=jnp.float32)
    params = (w1, b1, w2, b2, w3, b3)

    rep, score = hist_att_forward(x_item, user_hist, hist_len, params, batch_tile=16)
    rep, score = jax.block_until_ready((rep, score))

    rep_ref, score_ref = hist_att_reference(x_item, user_hist, hist_len, params)

    assert rep.shape == (B, q_dim), rep.shape
    assert score.shape == (B, L), score.shape
    rep_err = float(jnp.max(jnp.abs(rep - rep_ref)))
    score_err = float(jnp.max(jnp.abs(score - score_ref)))
    assert rep_err < 3e-2, rep_err      # bf16 matmul operands -> few e-3 typical
    assert score_err < 3e-2, score_err
    print("KERNEL_OK")
</pallas_src>

<mosaic_0001>
module attributes {stable_mosaic.version = 11 : i64} {
  func.func @_hist_att_kernel(%arg0: i32, %arg1: memref<16x32xf32, #tpu.memory_space<vmem>>, %arg2: memref<16x16x32xbf16, #tpu.memory_space<vmem>>, %arg3: memref<16x1xi32, #tpu.memory_space<vmem>>, %arg4: memref<32x256xbf16, #tpu.memory_space<vmem>>, %arg5: memref<32x256xbf16, #tpu.memory_space<vmem>>, %arg6: memref<32x256xbf16, #tpu.memory_space<vmem>>, %arg7: memref<1x256xf32, #tpu.memory_space<vmem>>, %arg8: memref<256x128xbf16, #tpu.memory_space<vmem>>, %arg9: memref<1x128xf32, #tpu.memory_space<vmem>>, %arg10: memref<1x1x128xf32, #tpu.memory_space<vmem>>, %arg11: memref<1x1xf32, #tpu.memory_space<vmem>>, %arg12: memref<16x32xf32, #tpu.memory_space<vmem>>, %arg13: memref<16x16xf32, #tpu.memory_space<vmem>>) attributes {dimension_semantics = [#tpu.dimension_semantics<parallel>], iteration_bounds = array<i64: 4>, scalar_prefetch = 0 : i64, scratch_operands = 0 : i64, tpu.core_type = #tpu.core_type<tc>, window_params = [{transform_indices = @transform_0, window_bounds = array<i64: 16, 32>}, {transform_indices = @transform_1, window_bounds = array<i64: 16, 16, 32>}, {transform_indices = @transform_2, window_bounds = array<i64: 16, 1>}, {pipeline_mode = #tpu.pipeline_mode<synchronous>, transform_indices = @transform_3, window_bounds = array<i64: 32, 256>}, {pipeline_mode = #tpu.pipeline_mode<synchronous>, transform_indices = @transform_4, window_bounds = array<i64: 32, 256>}, {pipeline_mode = #tpu.pipeline_mode<synchronous>, transform_indices = @transform_5, window_bounds = array<i64: 32, 256>}, {pipeline_mode = #tpu.pipeline_mode<synchronous>, transform_indices = @transform_6, window_bounds = array<i64: 1, 256>}, {pipeline_mode = #tpu.pipeline_mode<synchronous>, transform_indices = @transform_7, window_bounds = array<i64: 256, 128>}, {pipeline_mode = #tpu.pipeline_mode<synchronous>, transform_indices = @transform_8, window_bounds = array<i64: 1, 128>}, {pipeline_mode = #tpu.pipeline_mode<synchronous>, transform_indices = @transform_9, window_bounds = array<i64: 1, 1, 128>}, {pipeline_mode = #tpu.pipeline_mode<synchronous>, transform_indices = @transform_10, window_bounds = array<i64: 1, 1>}, {transform_indices = @transform_11, window_bounds = array<i64: 16, 32>}, {transform_indices = @transform_12, window_bounds = array<i64: 16, 16>}]} {
    %c0 = arith.constant 0 : index
    %c0_0 = arith.constant 0 : index
    %0 = vector.load %arg1[%c0, %c0_0] : memref<16x32xf32, #tpu.memory_space<vmem>>, vector<16x32xf32>
    %c0_1 = arith.constant 0 : index
    %c0_2 = arith.constant 0 : index
    %c0_3 = arith.constant 0 : index
    %1 = vector.load %arg2[%c0_1, %c0_2, %c0_3] : memref<16x16x32xbf16, #tpu.memory_space<vmem>>, vector<16x16x32xbf16>
    %2 = arith.extf %1 : vector<16x16x32xbf16> to vector<16x16x32xf32>
    %3 = vector.shape_cast %0 : vector<16x32xf32> to vector<16x1x32xf32>
    %4 = vector.broadcast %3 : vector<16x1x32xf32> to vector<16x16x32xf32>
    %5 = arith.mulf %4, %2 : vector<16x16x32xf32>
    %6 = vector.shape_cast %1 : vector<16x16x32xbf16> to vector<256x32xbf16>
    %7 = vector.shape_cast %5 : vector<16x16x32xf32> to vector<256x32xf32>
    %8 = arith.truncf %7 : vector<256x32xf32> to vector<256x32xbf16>
    %9 = arith.truncf %0 : vector<16x32xf32> to vector<16x32xbf16>
    %c0_4 = arith.constant 0 : index
    %c0_5 = arith.constant 0 : index
    %10 = vector.load %arg4[%c0_4, %c0_5] : memref<32x256xbf16, #tpu.memory_space<vmem>>, vector<32x256xbf16>
    %cst = arith.constant dense<0.000000e+00> : vector<16x256xf32>
    %11 = tpu.matmul %9, %10, %cst {dimension_numbers = #tpu.dot_dimension_numbers<[1], [0], [0], [1], [0, 0, 1, 1], [], []>} : vector<16x32xbf16>, vector<32x256xbf16>, vector<16x256xf32> -> vector<16x256xf32>
    %c0_6 = arith.constant 0 : index
    %c0_7 = arith.constant 0 : index
    %12 = vector.load %arg5[%c0_6, %c0_7] : memref<32x256xbf16, #tpu.memory_space<vmem>>, vector<32x256xbf16>
    %cst_8 = arith.constant dense<0.000000e+00> : vector<256x256xf32>
    %13 = tpu.matmul %6, %12, %cst_8 {dimension_numbers = #tpu.dot_dimension_numbers<[1], [0], [0], [1], [0, 0, 1, 1], [], []>} : vector<256x32xbf16>, vector<32x256xbf16>, vector<256x256xf32> -> vector<256x256xf32>
    %c0_9 = arith.constant 0 : index
    %c0_10 = arith.constant 0 : index
    %14 = vector.load %arg6[%c0_9, %c0_10] : memref<32x256xbf16, #tpu.memory_space<vmem>>, vector<32x256xbf16>
    %cst_11 = arith.constant dense<0.000000e+00> : vector<256x256xf32>
    %15 = tpu.matmul %8, %14, %cst_11 {dimension_numbers = #tpu.dot_dimension_numbers<[1], [0], [0], [1], [0, 0, 1, 1], [], []>} : vector<256x32xbf16>, vector<32x256xbf16>, vector<256x256xf32> -> vector<256x256xf32>
    %16 = arith.addf %13, %15 : vector<256x256xf32>
    %17 = vector.shape_cast %16 : vector<256x256xf32> to vector<16x16x256xf32>
    %18 = vector.shape_cast %11 : vector<16x256xf32> to vector<16x1x256xf32>
    %19 = vector.broadcast %18 : vector<16x1x256xf32> to vector<16x16x256xf32>
    %20 = arith.addf %17, %19 : vector<16x16x256xf32>
    %c0_12 = arith.constant 0 : index
    %c0_13 = arith.constant 0 : index
    %21 = vector.load %arg7[%c0_12, %c0_13] : memref<1x256xf32, #tpu.memory_space<vmem>>, vector<1x256xf32>
    %22 = vector.shape_cast %21 : vector<1x256xf32> to vector<1x1x256xf32>
    %23 = vector.broadcast %22 : vector<1x1x256xf32> to vector<16x16x256xf32>
    %24 = arith.addf %20, %23 : vector<16x16x256xf32>
    %cst_14 = arith.constant 0.000000e+00 : f32
    %25 = vector.broadcast %cst_14 : f32 to vector<16x16x256xf32>
    %26 = arith.maximumf %24, %25 : vector<16x16x256xf32>
    %27 = vector.shape_cast %26 : vector<16x16x256xf32> to vector<256x256xf32>
    %28 = arith.truncf %27 : vector<256x256xf32> to vector<256x256xbf16>
    %c0_15 = arith.constant 0 : index
    %c0_16 = arith.constant 0 : index
    %29 = vector.load %arg8[%c0_15, %c0_16] : memref<256x128xbf16, #tpu.memory_space<vmem>>, vector<256x128xbf16>
    %cst_17 = arith.constant dense<0.000000e+00> : vector<256x128xf32>
    %30 = tpu.matmul %28, %29, %cst_17 {dimension_numbers = #tpu.dot_dimension_numbers<[1], [0], [0], [1], [0, 0, 1, 1], [], []>} : vector<256x256xbf16>, vector<256x128xbf16>, vector<256x128xf32> -> vector<256x128xf32>
    %c0_18 = arith.constant 0 : index
    %c0_19 = arith.constant 0 : index
    %31 = vector.load %arg9[%c0_18, %c0_19] : memref<1x128xf32, #tpu.memory_space<vmem>>, vector<1x128xf32>
    %32 = vector.broadcast %31 : vector<1x128xf32> to vector<256x128xf32>
    %33 = arith.addf %30, %32 : vector<256x128xf32>
    %cst_20 = arith.constant 0.000000e+00 : f32
    %34 = vector.broadcast %cst_20 : f32 to vector<256x128xf32>
    %35 = arith.maximumf %33, %34 : vector<256x128xf32>
    %36 = vector.shape_cast %35 : vector<256x128xf32> to vector<16x16x128xf32>
    %c0_21 = arith.constant 0 : index
    %c0_22 = arith.constant 0 : index
    %c0_23 = arith.constant 0 : index
    %37 = vector.load %arg10[%c0_21, %c0_22, %c0_23] : memref<1x1x128xf32, #tpu.memory_space<vmem>>, vector<1x1x128xf32>
    %38 = vector.broadcast %37 : vector<1x1x128xf32> to vector<16x16x128xf32>
    %39 = arith.mulf %36, %38 : vector<16x16x128xf32>
    %cst_24 = arith.constant dense<0.000000e+00> : vector<16x16xf32>
    %40 = vector.multi_reduction <add>, %39, %cst_24 [2] : vector<16x16x128xf32> to vector<16x16xf32>
    %c0_25 = arith.constant 0 : index
    %c0_26 = arith.constant 0 : index
    %41 = vector.load %arg11[%c0_25, %c0_26] : memref<1x1xf32, #tpu.memory_space<vmem>>, vector<1x1xf32>
    %42 = vector.broadcast %41 : vector<1x1xf32> to vector<16x16xf32>
    %43 = arith.addf %40, %42 : vector<16x16xf32>
    %44 = tpu.iota {dimensions = array<i32: 1>} : vector<16x16xi32>
    %c0_27 = arith.constant 0 : index
    %c0_28 = arith.constant 0 : index
    %45 = vector.load %arg3[%c0_27, %c0_28] : memref<16x1xi32, #tpu.memory_space<vmem>>, vector<16x1xi32>
    %46 = vector.broadcast %45 : vector<16x1xi32> to vector<16x16xi32>
    %47 = arith.cmpi slt, %44, %46 : vector<16x16xi32>
    %cst_29 = arith.constant -1.024000e+03 : f32
    %48 = vector.broadcast %cst_29 : f32 to vector<16x16xf32>
    %49 = arith.select %47, %43, %48 : vector<16x16xi1>, vector<16x16xf32>
    %c0_30 = arith.constant 0 : index
    %c0_31 = arith.constant 0 : index
    %50 = vector.load %arg13[%c0_30, %c0_31] : memref<16x16xf32, #tpu.memory_space<vmem>>, vector<16x16xf32>
    tpu.vector_store %arg13[%c0_30, %c0_31], %49 {strides = array<i32>} : memref<16x16xf32, #tpu.memory_space<vmem>>, vector<16x16xf32>,
    %cst_32 = arith.constant dense<0xFF800000> : vector<16xf32>
    %51 = vector.multi_reduction <maximumf>, %49, %cst_32 [1] : vector<16x16xf32> to vector<16xf32>
    %52 = vector.shape_cast %51 : vector<16xf32> to vector<16x1xf32>
    %53 = vector.broadcast %52 : vector<16x1xf32> to vector<16x16xf32>
    %54 = arith.subf %49, %53 : vector<16x16xf32>
    %55 = math.exp %54 : vector<16x16xf32>
    %cst_33 = arith.constant dense<0.000000e+00> : vector<16xf32>
    %56 = vector.multi_reduction <add>, %55, %cst_33 [1] : vector<16x16xf32> to vector<16xf32>
    %57 = vector.shape_cast %56 : vector<16xf32> to vector<16x1xf32>
    %58 = tpu.reciprocal %57 {approx = true} : vector<16x1xf32> -> vector<16x1xf32>
    %59 = vector.broadcast %58 : vector<16x1xf32> to vector<16x16xf32>
    %60 = arith.mulf %55, %59 : vector<16x16xf32>
    %61 = vector.shape_cast %60 : vector<16x16xf32> to vector<16x16x1xf32>
    %62 = vector.broadcast %61 : vector<16x16x1xf32> to vector<16x16x32xf32>
    %63 = arith.mulf %2, %62 : vector<16x16x32xf32>
    %cst_34 = arith.constant dense<0.000000e+00> : vector<16x32xf32>
    %64 = vector.multi_reduction <add>, %63, %cst_34 [1] : vector<16x16x32xf32> to vector<16x32xf32>
    %c0_35 = arith.constant 0 : index
    %c0_36 = arith.constant 0 : index
    %65 = vector.load %arg12[%c0_35, %c0_36] : memref<16x32xf32, #tpu.memory_space<vmem>>, vector<16x32xf32>
    tpu.vector_store %arg12[%c0_35, %c0_36], %64 {strides = array<i32>} : memref<16x32xf32, #tpu.memory_space<vmem>>, vector<16x32xf32>,
    return
  }
  func.func @transform_0(%arg0: i32) -> (i32, i32) {
    %c0_i32 = arith.constant 0 : i32
    %c0_i32_0 = arith.constant 0 : i32
    return %arg0, %c0_i32 : i32, i32
  }
  func.func @transform_1(%arg0: i32) -> (i32, i32, i32) {
    %c0_i32 = arith.constant 0 : i32
    %c0_i32_0 = arith.constant 0 : i32
    %c0_i32_1 = arith.constant 0 : i32
    return %arg0, %c0_i32, %c0_i32_0 : i32, i32, i32
  }
  func.func @transform_2(%arg0: i32) -> (i32, i32) {
    %c0_i32 = arith.constant 0 : i32
    %c0_i32_0 = arith.constant 0 : i32
    return %arg0, %c0_i32 : i32, i32
  }
  func.func @transform_3(%arg0: i32) -> (i32, i32) {
    %c0_i32 = arith.constant 0 : i32
    %c0_i32_0 = arith.constant 0 : i32
    %c0_i32_1 = arith.constant 0 : i32
    return %c0_i32, %c0_i32_0 : i32, i32
  }
  func.func @transform_4(%arg0: i32) -> (i32, i32) {
    %c0_i32 = arith.constant 0 : i32
    %c0_i32_0 = arith.constant 0 : i32
    %c0_i32_1 = arith.constant 0 : i32
    return %c0_i32, %c0_i32_0 : i32, i32
  }
  func.func @transform_5(%arg0: i32) -> (i32, i32) {
    %c0_i32 = arith.constant 0 : i32
    %c0_i32_0 = arith.constant 0 : i32
    %c0_i32_1 = arith.constant 0 : i32
    return %c0_i32, %c0_i32_0 : i32, i32
  }
  func.func @transform_6(%arg0: i32) -> (i32, i32) {
    %c0_i32 = arith.constant 0 : i32
    %c0_i32_0 = arith.constant 0 : i32
    %c0_i32_1 = arith.constant 0 : i32
    return %c0_i32, %c0_i32_0 : i32, i32
  }
  func.func @transform_7(%arg0: i32) -> (i32, i32) {
    %c0_i32 = arith.constant 0 : i32
    %c0_i32_0 = arith.constant 0 : i32
    %c0_i32_1 = arith.constant 0 : i32
    return %c0_i32, %c0_i32_0 : i32, i32
  }
  func.func @transform_8(%arg0: i32) -> (i32, i32) {
    %c0_i32 = arith.constant 0 : i32
    %c0_i32_0 = arith.constant 0 : i32
    %c0_i32_1 = arith.constant 0 : i32
    return %c0_i32, %c0_i32_0 : i32, i32
  }
  func.func @transform_9(%arg0: i32) -> (i32, i32, i32) {
    %c0_i32 = arith.constant 0 : i32
    %c0_i32_0 = arith.constant 0 : i32
    %c0_i32_1 = arith.constant 0 : i32
    %c0_i32_2 = arith.constant 0 : i32
    return %c0_i32, %c0_i32_0, %c0_i32_1 : i32, i32, i32
  }
  func.func @transform_10(%arg0: i32) -> (i32, i32) {
    %c0_i32 = arith.constant 0 : i32
    %c0_i32_0 = arith.constant 0 : i32
    %c0_i32_1 = arith.constant 0 : i32
    return %c0_i32, %c0_i32_0 : i32, i32
  }
  func.func @transform_11(%arg0: i32) -> (i32, i32) {
    %c0_i32 = arith.constant 0 : i32
    %c0_i32_0 = arith.constant 0 : i32
    return %arg0, %c0_i32 : i32, i32
  }
  func.func @transform_12(%arg0: i32) -> (i32, i32) {
    %c0_i32 = arith.constant 0 : i32
    %c0_i32_0 = arith.constant 0 : i32
    return %arg0, %c0_i32 : i32, i32
  }
}

</mosaic_0001>

<bundles_post_ra>
// kernel: tpu_custom_call.1
= control target key start
LH: loop header
LB: loop body
LE: loop exit
PB: predicated region body
PF: predicated region fallthrough
CT: control target
= control target key end

     0   :  { %s3197_s23 = smov 0   ;;  %s4273_s0 = inlined_call_operand.vmem [shape: f32[64,32], index: 0, kind: input, shape index: {}]   ;;  %s4274_s1 = inlined_call_operand.vmem [shape: bf16[64,16,32], index: 1, kind: input, shape index: {}]   ;;  %s4275_s2 = inlined_call_operand.vmem [shape: s32[64,1], index: 2, kind: input, shape index: {}]   ;;  %s4276_s3 = inlined_call_operand.vmem [shape: bf16[32,256], index: 3, kind: input, shape index: {}]   ;;  %s4277_s4 = inlined_call_operand.vmem [shape: bf16[32,256], index: 4, kind: input, shape index: {}]   ;;  %s4278_s5 = inlined_call_operand.vmem [shape: bf16[32,256], index: 5, kind: input, shape index: {}]   ;;  %s4279_s6 = inlined_call_operand.vmem [shape: f32[1,256], index: 6, kind: input, shape index: {}]   ;;  %s4280_s7 = inlined_call_operand.vmem [shape: bf16[256,128], index: 7, kind: input, shape index: {}]   ;;  %s4281_s8 = inlined_call_operand.vmem [shape: f32[1,128], index: 8, kind: input, shape index: {}]   ;;  %s4282_s9 = inlined_call_operand.vmem [shape: f32[1,1,128], index: 9, kind: input, shape index: {}]   ;;  %s4283_s10 = inlined_call_operand.<no memory space> [shape: f32[1,1], index: 10, kind: input, shape index: {}]   ;;  %s4284_s11 = inlined_call_operand.vmem [shape: f32[64,32], index: 11, kind: output, shape index: {0}]   ;;  %s4285_s12 = inlined_call_operand.vmem [shape: f32[64,16], index: 12, kind: output, shape index: {1}]  }
   0x1   :  { %v18_v0 = vstv %s4283_s10 }
   0x2   :  { %19 = vst [vmem:[#allocation2] sm:$0x1] %v18_v0 }
   0x3 LB: > { %s2769_s24 = sadd.s32 4294967295, %s3126_s23   ;;  %p2773_p0 = scmp.ge.s32.totalorder %s3126_s23, 1  ;;  %s3126_s23 = sphi %s3197_s23, %s25_s23  }
   0x4   : > { %p391_p1 = scmp.lt.s32.totalorder %s3126_s23, 5 }
   0x6   : > { %p392_p2 = pnand %p2773_p0, %p391_p1 }
   0x8   : > { %395 = sbr.rel (%p392_p2) target bundleno = 1510 (0x5e6), region = 64 }
   0xd   : > { %v2795_v1 = vld [vmem:[%s4276_s3 + $0x10] sm:$0xf]  ;;  %v3049_v2 = vld [vmem:[%s4276_s3 + $0x14] sm:$0xf0]  ;;  %v3048_v3 = vld [vmem:[%s4276_s3 + $0x14] sm:$0xf] }
   0xe   : > { %v2796_v4 = vor.u32 %v3049_v2, %v2795_v1  ;;  %v2797_v5 = vld [vmem:[%s4276_s3 + $0x18] sm:$0xf0]  ;;  %v2787_v6 = vld [vmem:[%s4276_s3] sm:$0xf]  ;;  %v3047_v7 = vld [vmem:[%s4276_s3 + $0x4] sm:$0xf0] }
   0xf   : > { %v2800_v8 = vor.u32 %v3048_v3, %v2797_v5  ;;  %v3046_v9 = vld [vmem:[%s4276_s3 + $0x4] sm:$0xf]  ;;  %v2789_v10 = vld [vmem:[%s4276_s3 + $0x8] sm:$0xf0]  ;;  %s2774_s22 = sshll.u32 %s2769_s24, 1  ;;  %v2788_v11 = vor.u32 %v3047_v7, %v2787_v6  ;;  %s3235_s28 = sshll.u32 %s2769_s24, 4 }
  0x10   : > { %678 = vmatpush.bf16.msra.mxu0 %v2796_v4  ;;  %p450_p3 = scmp.lt.s32.totalorder %s2774_s22, 7  ;;  %v2813_v12 = vld [vmem:[%s4278_s5 + $0x10] sm:$0xf]  ;;  %v3057_v13 = vld [vmem:[%s4278_s5 + $0x14] sm:$0xf0]  ;;  %v2792_v14 = vor.u32 %v3046_v9, %v2789_v10  ;;  %p456_p4 = scmp.lt.s32.totalorder %s3235_s28, 63 }
  0x11   : > { %692 = vmatpush.bf16.msra.mxu1 %v2800_v8  ;;  %v2814_v15 = vor.u32 %v3057_v13, %v2813_v12  ;;  %v3056_v16 = vld [vmem:[%s4278_s5 + $0x14] sm:$0xf]  ;;  %v2815_v17 = vld [vmem:[%s4278_s5 + $0x18] sm:$0xf0]  ;;  %v2805_v18 = vld [vmem:[%s4278_s5] sm:$0xf] }
  0x12   : > { %s4429_s22 = smov (!%p450_p3, %s2774_s22), 7  ;;  %v2818_v19 = vor.u32 %v3056_v16, %v2815_v17  ;;  %v3055_v20 = vld [vmem:[%s4278_s5 + $0x4] sm:$0xf0]  ;;  %v3054_v21 = vld [vmem:[%s4278_s5 + $0x4] sm:$0xf]  ;;  %vm668_vm0 = vcmask 261120  }
  0x13   : > { %v2807_v22 = vld [vmem:[%s4278_s5 + $0x8] sm:$0xf0]  ;;  %v2925_v23 = vld [vmem:[%s4277_s4 + $0x10] sm:$0xf]  ;;  %3074 = vmatpush.bf16.msra.mxu2 %v2814_v15  ;;  %s3259_s10 = sshll.u32 %s4429_s22, 3  ;;  %v2806_v26 = vor.u32 %v3055_v20, %v2805_v18  ;;  %s4431_s28 = smov (!%p456_p4, %s3235_s28), 63 }
  0x14   : > { %679 = vmatpush.bf16.msra.mxu0 %v2788_v11  ;;  %v3053_v24 = vld [vmem:[%s4277_s4 + $0x14] sm:$0xf0]  ;;  %v3052_v25 = vld [vmem:[%s4277_s4 + $0x14] sm:$0xf]  ;;  %3076 = vmatpush.bf16.msra.mxu3 %v2818_v19  ;;  %s453_s16 = scalar_lea.vmem %s4273_s0, %s3259_s10  ;;  %v2927_v27 = vld [vmem:[%s4277_s4 + $0x18] sm:$0xf0]  ;;  %v2810_v30 = vor.u32 %v3054_v21, %v2807_v22  ;;  %s466_s19 = scalar_lea.vmem %s4275_s2, %s3259_s10 }
  0x15   : > { %693 = vmatpush.bf16.msra.mxu1 %v2792_v14  ;;  %v3274_v28 = vld [vmem:[%s453_s16] sm:$0xff]  ;;  %v3276_v29 = vld [vmem:[%s453_s16 + $0x8] sm:$0xff]  ;;  %v2926_v32 = vor.u32 %v3053_v24, %v2925_v23  ;;  %v2930_v33 = vor.u32 %v3052_v25, %v2927_v27  ;;  %s3029_s17 = sshll.u32 %s4431_s28, 3  ;;  %vm1286_vm1 = vcmask 1040384   ;;  %vm1288_vm2 = vcmask 1041409   ;;  %s4071_s25 = scalar_lea.vmem %s4285_s12, %s3259_s10 }
  0x16   : > { %v643_v31 = vpack.c.bf16 %v3276_v29, %v3274_v28  ;;  %s3288_s20 = scalar_lea.vmem %s4274_s1, %s3029_s17  ;;  %v563_v37 = vperm.slane %v3274_v28, 0  ;;  %v549_v41 = vrot.slane %v3274_v28, 1  ;;  %v550_v49 = vrot.slane %v3274_v28, 2  ;;  %v2917_v50 = vld [vmem:[%s4277_s4] sm:$0xf]  ;;  %s4198_s29 = scalar_lea.vmem %s4284_s11, %s3259_s10 }
  0x17   : > { %3075 = vmatpush.bf16.msra.mxu2 %v2806_v26  ;;  %v3291_v34 = vld [vmem:[%s3288_s20] sm:$0xff]   ;;  %v3304_v42 = vld [vmem:[%s3288_s20 + $0x8] sm:$0xff]   ;;  %v3325_v53 = vld [vmem:[%s3288_s20 + $0x10] sm:$0xff]   ;;  %v551_v63 = vrot.slane %v3274_v28, 3  ;;  %v552_v7 = vrot.slane %v3274_v28, 4  ;;  %v553_v16 = vrot.slane %v3274_v28, 5 }
  0x18   : > { %782 = vmatpush.bf16.msrb.mxu0 %v2814_v15  ;;  %3077 = vmatpush.bf16.msra.mxu3 %v2810_v30  ;;  %4350 = vst [vmem:[#allocation3_spill] sm:$0xff] %v3291_v34  ;;  %v4311_v35 = vunpack.c.l.bf16 %v3291_v34  ;;  %v4316_v36 = vunpack.c.h.bf16 %v3291_v34  ;;  %v4317_v43 = vunpack.c.l.bf16 %v3304_v42  ;;  %v4315_v44 = vunpack.c.h.bf16 %v3304_v42  ;;  %v3051_v51 = vld [vmem:[%s4277_s4 + $0x4] sm:$0xf0]  ;;  %v3050_v52 = vld [vmem:[%s4277_s4 + $0x4] sm:$0xf]  ;;  %v3340_v0 = vld [vmem:[%s3288_s20 + $0x18] sm:$0xff]  }
  0x19   : > { %871 = vmatpush.bf16.msrb.mxu1 %v2818_v19  ;;  %2801 = vmatmul.msk.bf16.vlgmr.msra.gmra.mxu0 %vm668_vm0, %v643_v31  ;;  %4351 = vst [vmem:[#allocation4_spill] sm:$0xff] %v3304_v42  ;;  %v564_v45 = vperm.slane %v549_v41, 0  ;;  %v2918_v54 = vor.u32 %v3051_v51, %v2917_v50  ;;  %v2919_v55 = vld [vmem:[%s4277_s4 + $0x8] sm:$0xf0]  ;;  %v4312_v57 = vunpack.c.l.bf16 %v3325_v53  ;;  %v4309_v58 = vunpack.c.h.bf16 %v3325_v53  ;;  %v3352_v8 = vld [vmem:[%s3288_s20 + $0x20] sm:$0xff]   ;;  %v3367_v17 = vld [vmem:[%s3288_s20 + $0x38] sm:$0xff]  }
  0x1a   : > { %2802 = vmatmul.msk.bf16.vlgmr.msra.gmra.mxu1 %vm668_vm0, %v643_v31  ;;  %v595_v38 = vmul.f32 %v563_v37, %v4311_v35  ;;  %v596_v39 = vmul.f32 %v563_v37, %v4316_v36  ;;  %4352 = vst [vmem:[#allocation5_spill] sm:$0xff] %v3325_v53  ;;  %v2922_v56 = vor.u32 %v3050_v52, %v2919_v55  ;;  %v565_v59 = vperm.slane %v550_v49, 0  ;;  %v3363_v15 = vld [vmem:[%s3288_s20 + $0x28] sm:$0xff]  }
  0x1b   : > { %v597_v46 = vmul.f32 %v564_v45, %v4317_v43  ;;  %v598_v47 = vmul.f32 %v564_v45, %v4315_v44  ;;  %4353 = vst [vmem:[#allocation6_spill] sm:$0xff] %v3340_v0  ;;  %v4310_v1 = vunpack.c.l.bf16 %v3340_v0  ;;  %v4305_v2 = vunpack.c.h.bf16 %v3340_v0 }
  0x1c   : > { %783 = vmatpush.bf16.msrb.mxu0 %v2806_v26  ;;  %v627_v40 = vpack.c.bf16 %v596_v39, %v595_v38  ;;  %v599_v60 = vmul.f32 %v565_v59, %v4312_v57  ;;  %v600_v61 = vmul.f32 %v565_v59, %v4309_v58  ;;  %v566_v3 = vperm.slane %v551_v63, 0  ;;  %4354 = vst [vmem:[#allocation7_spill] sm:$0xff] %v3352_v8  ;;  %v3065_v38 = vld [vmem:[%s4280_s7 + $0x38] sm:$0xff]  ;;  %v3072_v59 = vld [vmem:[%s4280_s7 + $0x70] sm:$0xff] }
  0x1d   : > { %872 = vmatpush.bf16.msrb.mxu1 %v2810_v30  ;;  %v628_v48 = vpack.c.bf16 %v598_v47, %v597_v46  ;;  %v4307_v9 = vunpack.c.l.bf16 %v3352_v8  ;;  %v4304_v10 = vunpack.c.h.bf16 %v3352_v8  ;;  %v567_v11 = vperm.slane %v552_v7, 0  ;;  %4355 = vst [vmem:[#allocation8_spill] sm:$0xff] %v3363_v15  ;;  %v3073_v39 = vld [vmem:[%s4280_s7 + $0x78] sm:$0xff]  ;;  %1750 = vmatpush.bf16.msrb.mxu2 %v3065_v38  ;;  %v3030_v7 = vld [vmem:[%s3288_s20] sm:$0xff] }
  0x1e   : > { %v629_v62 = vpack.c.bf16 %v600_v61, %v599_v60  ;;  %v601_v4 = vmul.f32 %v566_v3, %v4310_v1  ;;  %v602_v5 = vmul.f32 %v566_v3, %v4305_v2  ;;  %4356 = vst [vmem:[#allocation9_spill] sm:$0xff] %v3367_v17  ;;  %v555_v18 = vrot.slane %v3274_v28, 7  ;;  %1839 = vmatpush.bf16.msrb.mxu3 %v3073_v39  ;;  %v3424_v61 = vld [vmem:[%s3288_s20 + $0x48] sm:$0xff]  }
  0x1f   : > { %v603_v12 = vmul.f32 %v567_v11, %v4307_v9  ;;  %v604_v13 = vmul.f32 %v567_v11, %v4304_v10  ;;  %v4301_v19 = vunpack.c.l.bf16 %v3367_v17  ;;  %v4298_v20 = vunpack.c.h.bf16 %v3367_v17  ;;  %4359 = vst [vmem:[#allocation12_spill] sm:$0xff] %v3424_v61  ;;  %v1452_v17 = vld [vmem:[%s4279_s6] sm:$0x3] }
  0x20   : > { %1108 = vmatpush.bf16.msra.mxu0 %v2926_v32  ;;  %v630_v6 = vpack.c.bf16 %v602_v5, %v601_v4  ;;  %v570_v21 = vperm.slane %v555_v18, 0  ;;  %v4302_v22 = vunpack.c.l.bf16 %v3363_v15  ;;  %v4303_v23 = vunpack.c.h.bf16 %v3363_v15 }
  0x21   : > { %1197 = vmatpush.bf16.msra.mxu1 %v2930_v33  ;;  %v631_v14 = vpack.c.bf16 %v604_v13, %v603_v12  ;;  %v568_v24 = vperm.slane %v553_v16, 0  ;;  %v3387_v33 = vld [vmem:[%s3288_s20 + $0x30] sm:$0xff]   ;;  %v554_v37 = vrot.slane %v3274_v28, 6  ;;  %v571_v46 = vperm.slane %v3276_v29, 0 }
  0x22   : > { %v609_v25 = vmul.f32 %v570_v21, %v4301_v19  ;;  %v610_v26 = vmul.f32 %v570_v21, %v4298_v20  ;;  %4357 = vst [vmem:[#allocation10_spill] sm:$0xff] %v3387_v33  ;;  %v4297_v28 = vunpack.c.l.bf16 %v3387_v33  ;;  %v4296_v47 = vunpack.c.h.bf16 %v3387_v33  ;;  %1840 = vmatpush.bf16.msrb.mxu3 %v3072_v59  ;;  %v3068_v20 = vld [vmem:[%s4280_s7 + $0x50] sm:$0xff] }
  0x23   : > { %v605_v30 = vmul.f32 %v568_v24, %v4302_v22  ;;  %v606_v31 = vmul.f32 %v568_v24, %v4303_v23  ;;  %v556_v60 = vrot.slane %v3276_v29, 1  ;;  %v4290_v63 = vunpack.c.h.bf16 %v3424_v61  ;;  %v3599_v22 = vld [vmem:[%s3288_s20 + $0x70] sm:$0xff]  }
  0x24   : > { %1109 = vmatpush.bf16.msra.mxu0 %v2918_v54  ;;  %v634_v27 = vpack.c.bf16 %v610_v26, %v609_v25  ;;  %vm1291_vm3 = vcmask 1042434   ;;  %vm1294_vm4 = vcmask 1043459   ;;  %v557_v16 = vrot.slane %v3276_v29, 2  ;;  %v3451_v25 = vld [vmem:[%s3288_s20 + $0x50] sm:$0xff]   ;;  %4370 = vst [vmem:[#allocation23_spill] sm:$0xff] %v3599_v22 }
  0x25   : > { %1198 = vmatpush.bf16.msra.mxu1 %v2922_v56  ;;  %v632_v32 = vpack.c.bf16 %v606_v31, %v605_v30  ;;  %v3064_v56 = vld [vmem:[%s4280_s7 + $0x30] sm:$0xff]  ;;  %v572_v3 = vperm.slane %v556_v60, 0  ;;  %4360 = vst [vmem:[#allocation13_spill] sm:$0xff] %v3451_v25  ;;  %vm1297_vm5 = vcmask 1044484   ;;  %vm1300_vm6 = vcmask 1045509  }
  0x26   : > { %2826 = vmatmul.msk.bf16.vlgmr.msra.gmra.mxu2 %vm668_vm0, %v634_v27  ;;  %2842 = vmatmul.msk.bf16.vlgmr.msra.gmra.mxu3 %vm668_vm0, %v634_v27  ;;  %vm1303_vm7 = vcmask 1046534   ;;  %vm1306_vm8 = vcmask 1046528   ;;  %v4287_v26 = vunpack.c.l.bf16 %v3451_v25  ;;  %v4291_v27 = vunpack.c.h.bf16 %v3451_v25 }
  0x27   : > { %1751 = vmatpush.bf16.msrb.mxu2 %v3064_v56  ;;  %v614_v5 = vmul.f32 %v572_v3, %v4290_v63  ;;  %v573_v30 = vperm.slane %v557_v16, 0  ;;  %v3061_v63 = vld [vmem:[%s4280_s7 + $0x18] sm:$0xff]  ;;  %v561_v19 = vrot.slane %v3276_v29, 6  ;;  %vm2146_vm9 = vcmask 130112  }
  0x28   : > { %vm2199_vm10 = vcmask 1047559   ;;  %vm2212_vm11 = vcmask 130048  }
  0x29   : > { %2819 = vmatmul.msk.bf16.vlgmr.msrb.gmra.mxu0 %vm668_vm0, %v627_v40 }
  0x2a   : > { %2835 = vmatmul.msk.bf16.vlgmr.msrb.gmra.mxu1 %vm668_vm0, %v627_v40  ;;  %v3397_v40 = vld [vmem:[%s3288_s20 + $0x40] sm:$0xff]  }
  0x2b   : > { %4358 = vst [vmem:[#allocation11_spill] sm:$0xff] %v3397_v40  ;;  %v4294_v41 = vunpack.c.l.bf16 %v3397_v40  ;;  %v4288_v45 = vunpack.c.h.bf16 %v3397_v40 }
  0x2d   : > { %v611_v49 = vmul.f32 %v571_v46, %v4294_v41  ;;  %v612_v50 = vmul.f32 %v571_v46, %v4288_v45  ;;  %v3541_v45 = vld [vmem:[%s3288_s20 + $0x60] sm:$0xff]   ;;  %v560_v41 = vrot.slane %v3276_v29, 5 }
  0x2e   : > { %4368 = vst [vmem:[#allocation21_spill] sm:$0xff] %v3541_v45 }
  0x2f   : > { %v635_v51 = vpack.c.bf16 %v612_v50, %v611_v49 }
  0x36   : > { %2827 = vmatmul.msk.bf16.gmra.mxu2 %vm668_vm0, %v635_v51  ;;  %2843 = vmatmul.msk.bf16.gmra.mxu3 %vm668_vm0, %v635_v51 }
  0x39   : > { %2820 = vmatmul.msk.bf16.gmra.mxu0 %vm668_vm0, %v628_v48 }
  0x3a   : > { %2836 = vmatmul.msk.bf16.gmra.mxu1 %vm668_vm0, %v628_v48  ;;  %v569_v48 = vperm.slane %v554_v37, 0  ;;  %v616_v37 = vmul.f32 %v573_v30, %v4291_v27  ;;  %v3069_v27 = vld [vmem:[%s4280_s7 + $0x58] sm:$0xff] }
  0x3c   : > { %v607_v52 = vmul.f32 %v569_v48, %v4297_v28  ;;  %v608_v54 = vmul.f32 %v569_v48, %v4296_v47  ;;  %v3071_v48 = vld [vmem:[%s4280_s7 + $0x68] sm:$0xff]  ;;  %v3060_v28 = vld [vmem:[%s4280_s7 + $0x10] sm:$0xff] }
  0x3d   : > { %1841 = vmatpush.bf16.msrb.mxu3 %v3071_v48 }
  0x3e   : > { %v633_v55 = vpack.c.bf16 %v608_v54, %v607_v52 }
  0x49   : > { %2821 = vmatmul.msk.bf16.gmra.mxu0 %vm668_vm0, %v629_v62 }
  0x4a   : > { %2837 = vmatmul.msk.bf16.gmra.mxu1 %vm668_vm0, %v629_v62  ;;  %v4295_v62 = vunpack.c.l.bf16 %v3424_v61 }
  0x4c   : > { %v613_v4 = vmul.f32 %v572_v3, %v4295_v62  ;;  %v3570_v62 = vld [vmem:[%s3288_s20 + $0x68] sm:$0xff]  }
  0x4d   : > { %4369 = vst [vmem:[#allocation22_spill] sm:$0xff] %v3570_v62 }
  0x59   : > { %2822 = vmatmul.msk.bf16.gmra.mxu0 %vm668_vm0, %v630_v6 }
  0x5a   : > { %2838 = vmatmul.msk.bf16.gmra.mxu1 %vm668_vm0, %v630_v6  ;;  %v636_v6 = vpack.c.bf16 %v614_v5, %v613_v4  ;;  %v3031_v4 = vld [vmem:[%s3288_s20 + $0x8] sm:$0xff] }
  0x5c   : > { %2828 = vmatmul.msk.bf16.gmra.mxu2 %vm668_vm0, %v636_v6  ;;  %2844 = vmatmul.msk.bf16.gmra.mxu3 %vm668_vm0, %v636_v6 }
  0x69   : > { %2823 = vmatmul.msk.bf16.gmra.mxu0 %vm668_vm0, %v631_v14 }
  0x6a   : > { %2839 = vmatmul.msk.bf16.gmra.mxu1 %vm668_vm0, %v631_v14  ;;  %v3063_v14 = vld [vmem:[%s4280_s7 + $0x28] sm:$0xff] }
  0x6b   : > { %1752 = vmatpush.bf16.msrb.mxu2 %v3063_v14  ;;  %v3512_v14 = vld [vmem:[%s3288_s20 + $0x58] sm:$0xff]  }
  0x6c   : > { %4367 = vst [vmem:[#allocation20_spill] sm:$0xff] %v3512_v14  ;;  %v4286_v16 = vunpack.c.l.bf16 %v3512_v14 }
  0x79   : > { %2824 = vmatmul.msk.bf16.gmra.mxu0 %vm668_vm0, %v632_v32 }
  0x7a   : > { %2840 = vmatmul.msk.bf16.gmra.mxu1 %vm668_vm0, %v632_v32  ;;  %v615_v32 = vmul.f32 %v573_v30, %v4287_v26  ;;  %v4289_v30 = vunpack.c.h.bf16 %v3512_v14  ;;  %v559_v26 = vrot.slane %v3276_v29, 4 }
  0x7c   : > { %v637_v54 = vpack.c.bf16 %v616_v37, %v615_v32 }
  0x7e   : > { %2829 = vmatmul.msk.bf16.gmra.mxu2 %vm668_vm0, %v637_v54  ;;  %2845 = vmatmul.msk.bf16.gmra.mxu3 %vm668_vm0, %v637_v54  ;;  %v3070_v54 = vld [vmem:[%s4280_s7 + $0x60] sm:$0xff] }
  0x7f   : > { %1842 = vmatpush.bf16.msrb.mxu3 %v3070_v54 }
  0x83   : > { %1843 = vmatpush.bf16.msrb.mxu3 %v3069_v27  ;;  %v4299_v27 = vunpack.c.h.bf16 %v3570_v62 }
  0x87   : > { %1844 = vmatpush.bf16.msrb.mxu3 %v3068_v20  ;;  %v4306_v20 = vunpack.c.l.bf16 %v3599_v22 }
  0x89   : > { %2825 = vmatmul.msk.bf16.gmra.mxu0 %vm668_vm0, %v633_v55 }
  0x8a   : > { %2841 = vmatmul.msk.bf16.gmra.mxu1 %vm668_vm0, %v633_v55 }
  0x96   : > { %v681_v11 = vpop.f32.mrf.mxu0 }
  0x97   : > { %v695_v12 = vpop.f32.mrf.mxu1 }
  0x98   : > { %v1284_v13 = vrot.slane %v695_v12, 7 }
  0x99   : > { %2931 = vmatmul.msk.bf16.vlgmr.msra.gmra.mxu0 %vm668_vm0, %v3030_v7 }
  0x9a   : > { %2947 = vmatmul.msk.bf16.vlgmr.msra.gmra.mxu1 %vm668_vm0, %v3030_v7  ;;  %v3442_v18 = vsel %vm1286_vm1, %v681_v11, %v1284_v13  ;;  %v3445_v21 = vsel %vm1288_vm2, %v681_v11, %v1284_v13  ;;  %v3448_v24 = vsel %vm1291_vm3, %v681_v11, %v1284_v13  ;;  %v3456_v31 = vsel %vm1294_vm4, %v681_v11, %v1284_v13 }
  0x9b   : > { %v3463_v38 = vsel %vm1297_vm5, %v681_v11, %v1284_v13  ;;  %v3469_v49 = vsel %vm1300_vm6, %v681_v11, %v1284_v13  ;;  %v3472_v50 = vsel %vm1303_vm7, %v681_v11, %v1284_v13  ;;  %v3475_v51 = vsel %vm1306_vm8, %v1284_v13, %v681_v11 }
  0x9c   : > { %v558_v13 = vrot.slane %v3276_v29, 3  ;;  %v1324_v15 = vperm.slane %v3442_v18, 0  ;;  %v1325_v8 = vperm.slane %v3442_v18, 1 }
  0x9e   : > { %v683_v39 = vpop.f32.mrf.mxu0  ;;  %v574_v32 = vperm.slane %v558_v13, 0  ;;  %v3032_v13 = vld [vmem:[%s3288_s20 + $0x10] sm:$0xff] }
  0x9f   : > { %v697_v46 = vpop.f32.mrf.mxu1 }
  0xa0   : > { %v1285_v52 = vrot.slane %v697_v46, 7  ;;  %v617_v37 = vmul.f32 %v574_v32, %v4286_v16 }
  0xa2   : > { %v3480_v55 = vsel %vm1286_vm1, %v683_v39, %v1285_v52  ;;  %v3483_v56 = vsel %vm1288_vm2, %v683_v39, %v1285_v52  ;;  %v3486_v59 = vsel %vm1291_vm3, %v683_v39, %v1285_v52  ;;  %v3489_v60 = vsel %vm1294_vm4, %v683_v39, %v1285_v52 }
  0xa3   : > { %4361 = vst [vmem:[#allocation14_spill] sm:$0xff] %v3486_v59  ;;  %v3492_v3 = vsel %vm1297_vm5, %v683_v39, %v1285_v52  ;;  %v3496_v5 = vsel %vm1300_vm6, %v683_v39, %v1285_v52  ;;  %v3499_v6 = vsel %vm1303_vm7, %v683_v39, %v1285_v52  ;;  %v3506_v12 = vsel %vm1306_vm8, %v1285_v52, %v683_v39  ;;  %v3062_v52 = vld [vmem:[%s4280_s7 + $0x20] sm:$0xff]  ;;  %v3039_v59 = vld [vmem:[%s3288_s20 + $0x48] sm:$0xff] }
  0xa4   : > { %4362 = vst [vmem:[#allocation15_spill] sm:$0xff] %v3489_v60  ;;  %v618_v39 = vmul.f32 %v574_v32, %v4289_v30  ;;  %1753 = vmatpush.bf16.msrb.mxu2 %v3062_v52  ;;  %v575_v52 = vperm.slane %v559_v26, 0 }
  0xa5   : > { %4363 = vst [vmem:[#allocation16_spill] sm:$0xff] %v3492_v3 }
  0xa6   : > { %4364 = vst [vmem:[#allocation17_spill] sm:$0xff] %v3496_v5  ;;  %v3501_v7 = vpop.f32.mrf.mxu0 }
  0xa7   : > { %4365 = vst [vmem:[#allocation18_spill] sm:$0xff] %v3499_v6  ;;  %v3503_v11 = vpop.f32.mrf.mxu1 }
  0xa8   : > { %4366 = vst [vmem:[#allocation19_spill] sm:$0xff] %v3506_v12  ;;  %1754 = vmatpush.bf16.msrb.mxu2 %v3061_v63  ;;  %v4300_v63 = vunpack.c.l.bf16 %v3570_v62 }
  0xa9   : > { %2932 = vmatmul.msk.bf16.gmra.mxu0 %vm668_vm0, %v3031_v4 }
  0xaa   : > { %2948 = vmatmul.msk.bf16.gmra.mxu1 %vm668_vm0, %v3031_v4  ;;  %v638_v4 = vpack.c.bf16 %v618_v39, %v617_v37  ;;  %v4292_v37 = vunpack.c.l.bf16 %v3541_v45  ;;  %v4293_v39 = vunpack.c.h.bf16 %v3541_v45 }
  0xac   : > { %2830 = vmatmul.msk.bf16.gmra.mxu2 %vm668_vm0, %v638_v4  ;;  %2846 = vmatmul.msk.bf16.gmra.mxu3 %vm668_vm0, %v638_v4  ;;  %v619_v54 = vmul.f32 %v575_v52, %v4292_v37  ;;  %v620_v4 = vmul.f32 %v575_v52, %v4293_v39  ;;  %v3033_v52 = vld [vmem:[%s3288_s20 + $0x18] sm:$0xff] }
  0xad   : > { %1755 = vmatpush.bf16.msrb.mxu2 %v3060_v28  ;;  %v4308_v28 = vunpack.c.h.bf16 %v3599_v22 }
  0xae   : > { %v3520_v46 = vpop.f32.mrf.mxu0  ;;  %v639_v26 = vpack.c.bf16 %v620_v4, %v619_v54  ;;  %v576_v54 = vperm.slane %v560_v41, 0 }
  0xaf   : > { %v3522_v48 = vpop.f32.mrf.mxu1 }
  0xb0   : > { %v621_v4 = vmul.f32 %v576_v54, %v4300_v63 }
  0xb6   : > { %v3533_v32 = vpop.f32.mrf.mxu0 }
  0xb7   : > { %v3535_v16 = vpop.f32.mrf.mxu1 }
  0xb9   : > { %2933 = vmatmul.msk.bf16.gmra.mxu0 %vm668_vm0, %v3032_v13 }
  0xba   : > { %2949 = vmatmul.msk.bf16.gmra.mxu1 %vm668_vm0, %v3032_v13 }
  0xbc   : > { %2831 = vmatmul.msk.bf16.gmra.mxu2 %vm668_vm0, %v639_v26  ;;  %2847 = vmatmul.msk.bf16.gmra.mxu3 %vm668_vm0, %v639_v26  ;;  %v622_v26 = vmul.f32 %v576_v54, %v4299_v27  ;;  %v3034_v54 = vld [vmem:[%s3288_s20 + $0x20] sm:$0xff] }
  0xbe   : > { %v3549_v30 = vpop.f32.mrf.mxu0  ;;  %v640_v41 = vpack.c.bf16 %v622_v26, %v621_v4  ;;  %v577_v4 = vperm.slane %v561_v19, 0  ;;  %v3035_v19 = vld [vmem:[%s3288_s20 + $0x28] sm:$0xff] }
  0xbf   : > { %v3551_v13 = vpop.f32.mrf.mxu1 }
  0xc0   : > { %v623_v26 = vmul.f32 %v577_v4, %v4306_v20 }
  0xc6   : > { %v3562_v37 = vpop.f32.mrf.mxu0 }
  0xc7   : > { %v3564_v39 = vpop.f32.mrf.mxu1 }
  0xc9   : > { %2934 = vmatmul.msk.bf16.gmra.mxu0 %vm668_vm0, %v3033_v52 }
  0xca   : > { %2950 = vmatmul.msk.bf16.gmra.mxu1 %vm668_vm0, %v3033_v52 }
  0xcc   : > { %2832 = vmatmul.msk.bf16.gmra.mxu2 %vm668_vm0, %v640_v41  ;;  %2848 = vmatmul.msk.bf16.gmra.mxu3 %vm668_vm0, %v640_v41  ;;  %v624_v41 = vmul.f32 %v577_v4, %v4308_v28  ;;  %v3067_v4 = vld [vmem:[%s4280_s7 + $0x48] sm:$0xff] }
  0xcd   : > { %1845 = vmatpush.bf16.msrb.mxu3 %v3067_v4 }
  0xce   : > { %v3578_v47 = vpop.f32.mrf.mxu0  ;;  %v641_v2 = vpack.c.bf16 %v624_v41, %v623_v26  ;;  %v562_v26 = vrot.slane %v3276_v29, 7  ;;  %v3628_v41 = vld [vmem:[%s3288_s20 + $0x78] sm:$0xff]   ;;  %v3036_v29 = vld [vmem:[%s3288_s20 + $0x30] sm:$0xff] }
  0xcf   : > { %v3580_v52 = vpop.f32.mrf.mxu1  ;;  %4371 = vst [vmem:[#allocation24_spill] sm:$0xff] %v3628_v41 }
  0xd0   : > { %v578_v28 = vperm.slane %v562_v26, 0 }
  0xd6   : > { %v3591_v27 = vpop.f32.mrf.mxu0 }
  0xd7   : > { %v3593_v63 = vpop.f32.mrf.mxu1 }
  0xd9   : > { %2935 = vmatmul.msk.bf16.gmra.mxu0 %vm668_vm0, %v3034_v54 }
  0xda   : > { %2951 = vmatmul.msk.bf16.gmra.mxu1 %vm668_vm0, %v3034_v54  ;;  %v3059_v54 = vld [vmem:[%s4280_s7 + $0x8] sm:$0xff] }
  0xdb   : > { %1756 = vmatpush.bf16.msrb.mxu2 %v3059_v54  ;;  %v4313_v54 = vunpack.c.h.bf16 %v3628_v41 }
  0xdc   : > { %2833 = vmatmul.msk.bf16.gmra.mxu2 %vm668_vm0, %v641_v2  ;;  %2849 = vmatmul.msk.bf16.gmra.mxu3 %vm668_vm0, %v641_v2  ;;  %v4314_v2 = vunpack.c.l.bf16 %v3628_v41 }
  0xdd   : > { %v626_v1 = vmul.f32 %v578_v28, %v4313_v54  ;;  %v3651_v54 = vpop.f32.mrf.mxu3 }
  0xde   : > { %v3607_v23 = vpop.f32.mrf.mxu0  ;;  %v625_v58 = vmul.f32 %v578_v28, %v4314_v2  ;;  %v3649_v28 = vpop.f32.mrf.mxu2 }
  0xdf   : > { %v3609_v10 = vpop.f32.mrf.mxu1 }
  0xe5   : > { %v3666_v36 = vpop.f32.mrf.mxu3 }
  0xe6   : > { %v3617_v20 = vpop.f32.mrf.mxu0  ;;  %v3664_v44 = vpop.f32.mrf.mxu2 }
  0xe7   : > { %v3619_v9 = vpop.f32.mrf.mxu1 }
  0xe9   : > { %2936 = vmatmul.msk.bf16.gmra.mxu0 %vm668_vm0, %v3035_v19 }
  0xea   : > { %2952 = vmatmul.msk.bf16.gmra.mxu1 %vm668_vm0, %v3035_v19  ;;  %v642_v19 = vpack.c.bf16 %v626_v1, %v625_v58  ;;  %v3058_v58 = vld [vmem:[%s4280_s7] sm:$0xff] }
  0xeb   : > { %v3066_v1 = vld [vmem:[%s4280_s7 + $0x40] sm:$0xff]  ;;  %1757 = vmatpush.bf16.msrb.mxu2 %v3058_v58 }
  0xec   : > { %2834 = vmatmul.msk.bf16.gmra.mxu2 %vm668_vm0, %v642_v19  ;;  %2850 = vmatmul.msk.bf16.gmra.mxu3 %vm668_vm0, %v642_v19 }
  0xed   : > { %1846 = vmatpush.bf16.msrb.mxu3 %v3066_v1  ;;  %v3680_v58 = vpop.f32.mrf.mxu3  ;;  %v3038_v1 = vld [vmem:[%s3288_s20 + $0x40] sm:$0xff] }
  0xee   : > { %v3636_v4 = vpop.f32.mrf.mxu0  ;;  %v3678_v62 = vpop.f32.mrf.mxu2 }
  0xef   : > { %v3638_v35 = vpop.f32.mrf.mxu1 }
  0xf5   : > { %v3689_v33 = vpop.f32.mrf.mxu3 }
  0xf6   : > { %v3643_v57 = vpop.f32.mrf.mxu0 }
  0xf7   : > { %v3645_v26 = vpop.f32.mrf.mxu1 }
  0xf9   : > { %2937 = vmatmul.msk.bf16.gmra.mxu0 %vm668_vm0, %v3036_v29 }
  0xfa   : > { %2953 = vmatmul.msk.bf16.gmra.mxu1 %vm668_vm0, %v3036_v29  ;;  %v3037_v29 = vld [vmem:[%s3288_s20 + $0x38] sm:$0xff] }
  0xfe   : > { %v3659_v19 = vpop.f32.mrf.mxu0 }
  0xff   : > { %v3661_v2 = vpop.f32.mrf.mxu1 }
 0x106   : > { %v3668_v43 = vpop.f32.mrf.mxu0 }
 0x107   : > { %v3670_v41 = vpop.f32.mrf.mxu1 }
 0x109   : > { %2938 = vmatmul.msk.bf16.gmra.mxu0 %vm668_vm0, %v3037_v29 }
 0x10a   : > { %2954 = vmatmul.msk.bf16.gmra.mxu1 %vm668_vm0, %v3037_v29  ;;  %v3687_v29 = vpop.f32.mrf.mxu2 }
 0x10e   : > { %v3674_v22 = vpop.f32.mrf.mxu0 }
 0x10f   : > { %v3676_v45 = vpop.f32.mrf.mxu1 }
 0x116   : > { %v1111_v14 = vpop.f32.mrf.mxu0 }
 0x117   : > { %v1200_v25 = vpop.f32.mrf.mxu1  ;;  %v1112_v40 = vadd.f32 %v1111_v14, %v3501_v7  ;;  %v3696_v7 = vperm.slane %v1452_v17, 0 }
 0x118   : > { %v1201_v61 = vadd.f32 %v1200_v25, %v3503_v11  ;;  %v3698_v11 = vperm.slane %v1452_v17, 1  ;;  %v3708_v17 = vpop.f32.mrf.mxu3 }
 0x119   : > { %2939 = vmatmul.msk.bf16.gmra.mxu0 %vm668_vm0, %v3038_v1  ;;  %v1388_v0 = vadd.f32 %v1324_v15, %v1112_v40 }
 0x11a   : > { %2955 = vmatmul.msk.bf16.gmra.mxu1 %vm668_vm0, %v3038_v1  ;;  %v1389_v25 = vadd.f32 %v1325_v8, %v1201_v61  ;;  %v3706_v61 = vpop.f32.mrf.mxu2 }
 0x11b   : > { %v1458_v42 = vadd.f32 %v3696_v7, %v1388_v0  ;;  %v1290_v0 = vrot.slane %v3445_v21, 1 }
 0x11c   : > { %v1459_v12 = vadd.f32 %v3698_v11, %v1389_v25 }
 0x11d   : > { %v1522_v3 = vmax.f32 %v1458_v42, 0.0  ;;  %v1326_v42 = vperm.slane %v1290_v0, 0 }
 0x11e   : > { %v1113_v14 = vpop.f32.mrf.mxu0  ;;  %v1523_v60 = vmax.f32 %v1459_v12, 0.0 }
 0x11f   : > { %v1202_v1 = vpop.f32.mrf.mxu1  ;;  %v1114_v53 = vadd.f32 %v1113_v14, %v3520_v46 }
 0x120   : > { %v1203_v34 = vadd.f32 %v1202_v1, %v3522_v48  ;;  %v3718_v21 = vpop.f32.mrf.mxu3 }
 0x121   : > { %v1390_v6 = vadd.f32 %v1324_v15, %v1114_v53  ;;  %v1327_v15 = vperm.slane %v1290_v0, 1  ;;  %4372 = vst [vmem:[#allocation25_spill] sm:$0xff] %v3718_v21 }
 0x122   : > { %v1391_v5 = vadd.f32 %v1325_v8, %v1203_v34  ;;  %v3716_v12 = vpop.f32.mrf.mxu2 }
 0x123   : > { %v1460_v40 = vadd.f32 %v3696_v7, %v1390_v6 }
 0x124   : > { %v1461_v18 = vadd.f32 %v3698_v11, %v1391_v5 }
 0x125   : > { %v1524_v46 = vmax.f32 %v1460_v40, 0.0 }
 0x126   : > { %v1525_v14 = vmax.f32 %v1461_v18, 0.0  ;;  %v1116_v48 = vpop.f32.mrf.mxu0 }
 0x127   : > { %v1205_v1 = vpop.f32.mrf.mxu1  ;;  %v1586_v25 = vpack.c.bf16 %v1524_v46, %v1522_v3  ;;  %v1117_v34 = vadd.f32 %v1116_v48, %v3533_v32 }
 0x128   : > { %v1587_v53 = vpack.c.bf16 %v1525_v14, %v1523_v60  ;;  %v1206_v8 = vadd.f32 %v1205_v1, %v3535_v16  ;;  %v3040_v1 = vld [vmem:[%s3288_s20 + $0x50] sm:$0xff] }
 0x129   : > { %2940 = vmatmul.msk.bf16.gmra.mxu0 %vm668_vm0, %v3039_v59  ;;  %1758 = vmatmul.bf16.vlgmr.msrb.gmra.mxu2 %v1586_v25  ;;  %v1392_v5 = vadd.f32 %v1326_v42, %v1117_v34 }
 0x12a   : > { %2956 = vmatmul.msk.bf16.gmra.mxu1 %vm668_vm0, %v3039_v59  ;;  %1847 = vmatmul.bf16.vlgmr.msrb.gmra.mxu3 %v1587_v53  ;;  %v1393_v6 = vadd.f32 %v1327_v15, %v1206_v8 }
 0x12b   : > { %v1462_v59 = vadd.f32 %v3696_v7, %v1392_v5  ;;  %v3730_v5 = vpop.f32.mrf.mxu3 }
 0x12c   : > { %v1463_v46 = vadd.f32 %v3698_v11, %v1393_v6 }
 0x12d   : > { %v1526_v0 = vmax.f32 %v1462_v59, 0.0 }
 0x12e   : > { %v1118_v60 = vpop.f32.mrf.mxu0  ;;  %v1527_v53 = vmax.f32 %v1463_v46, 0.0 }
 0x12f   : > { %v1207_v3 = vpop.f32.mrf.mxu1  ;;  %v1119_v32 = vadd.f32 %v1118_v60, %v3549_v30  ;;  %v1293_v30 = vrot.slane %v3448_v24, 2 }
 0x130   : > { %v1208_v16 = vadd.f32 %v1207_v3, %v3551_v13 }
 0x131   : > { %v1394_v40 = vadd.f32 %v1326_v42, %v1119_v32  ;;  %v1328_v3 = vperm.slane %v1293_v30, 0  ;;  %v1329_v32 = vperm.slane %v1293_v30, 1 }
 0x132   : > { %v1395_v18 = vadd.f32 %v1327_v15, %v1208_v16  ;;  %v3728_v15 = vpop.f32.mrf.mxu2 }
 0x133   : > { %v1464_v14 = vadd.f32 %v3696_v7, %v1394_v40 }
 0x134   : > { %v1465_v48 = vadd.f32 %v3698_v11, %v1395_v18 }
 0x135   : > { %v1528_v25 = vmax.f32 %v1464_v14, 0.0 }
 0x136   : > { %v1529_v34 = vmax.f32 %v1465_v48, 0.0  ;;  %v1121_v8 = vpop.f32.mrf.mxu0 }
 0x137   : > { %v1210_v21 = vpop.f32.mrf.mxu1  ;;  %v1588_v13 = vpack.c.bf16 %v1528_v25, %v1526_v0  ;;  %v1122_v6 = vadd.f32 %v1121_v8, %v3562_v37 }
 0x138   : > { %v1589_v42 = vpack.c.bf16 %v1529_v34, %v1527_v53  ;;  %v1211_v60 = vadd.f32 %v1210_v21, %v3564_v39  ;;  %v3041_v53 = vld [vmem:[%s3288_s20 + $0x58] sm:$0xff] }
 0x139   : > { %2941 = vmatmul.msk.bf16.gmra.mxu0 %vm668_vm0, %v3040_v1  ;;  %1763 = vmatmul.bf16.gmra.mxu2 %v1588_v13  ;;  %v1396_v24 = vadd.f32 %v1328_v3, %v1122_v6 }
 0x13a   : > { %2957 = vmatmul.msk.bf16.gmra.mxu1 %vm668_vm0, %v3040_v1  ;;  %1852 = vmatmul.bf16.gmra.mxu3 %v1589_v42  ;;  %v1397_v16 = vadd.f32 %v1329_v32, %v1211_v60  ;;  %v3740_v48 = vpop.f32.mrf.mxu2  ;;  %v3742_v1 = vpop.f32.mrf.mxu3  ;;  %v1296_v42 = vrot.slane %v3456_v31, 3 }
 0x13b   : > { %v1466_v39 = vadd.f32 %v3696_v7, %v1396_v24 }
 0x13c   : > { %v1467_v21 = vadd.f32 %v3698_v11, %v1397_v16  ;;  %v1330_v24 = vperm.slane %v1296_v42, 0  ;;  %v1331_v16 = vperm.slane %v1296_v42, 1 }
 0x13d   : > { %v1530_v34 = vmax.f32 %v1466_v39, 0.0 }
 0x13e   : > { %v1123_v40 = vpop.f32.mrf.mxu0 }
 0x13f   : > { %v1212_v18 = vpop.f32.mrf.mxu1  ;;  %v1124_v59 = vadd.f32 %v1123_v40, %v3578_v47  ;;  %v1531_v47 = vmax.f32 %v1467_v21, 0.0 }
 0x140   : > { %v1213_v46 = vadd.f32 %v1212_v18, %v3580_v52 }
 0x141   : > { %v1398_v37 = vadd.f32 %v1328_v3, %v1124_v59 }
 0x142   : > { %v1399_v14 = vadd.f32 %v1329_v32, %v1213_v46  ;;  %v3752_v40 = vpop.f32.mrf.mxu2  ;;  %v3754_v18 = vpop.f32.mrf.mxu3 }
 0x143   : > { %v1468_v0 = vadd.f32 %v3696_v7, %v1398_v37 }
 0x144   : > { %v1469_v25 = vadd.f32 %v3698_v11, %v1399_v14 }
 0x145   : > { %v1532_v8 = vmax.f32 %v1468_v0, 0.0 }
 0x146   : > { %v1533_v30 = vmax.f32 %v1469_v25, 0.0  ;;  %v1126_v52 = vpop.f32.mrf.mxu0 }
 0x147   : > { %v1215_v13 = vpop.f32.mrf.mxu1  ;;  %v1590_v6 = vpack.c.bf16 %v1532_v8, %v1530_v34  ;;  %v1127_v3 = vadd.f32 %v1126_v52, %v3591_v27 }
 0x148   : > { %v1591_v60 = vpack.c.bf16 %v1533_v30, %v1531_v47  ;;  %v1216_v32 = vadd.f32 %v1215_v13, %v3593_v63  ;;  %v3042_v47 = vld [vmem:[%s3288_s20 + $0x60] sm:$0xff] }
 0x149   : > { %2942 = vmatmul.msk.bf16.gmra.mxu0 %vm668_vm0, %v3041_v53  ;;  %1768 = vmatmul.bf16.gmra.mxu2 %v1590_v6  ;;  %v1400_v31 = vadd.f32 %v1330_v24, %v1127_v3  ;;  %v1299_v6 = vrot.slane %v3463_v38, 4 }
 0x14a   : > { %2958 = vmatmul.msk.bf16.gmra.mxu1 %vm668_vm0, %v3041_v53  ;;  %1857 = vmatmul.bf16.gmra.mxu3 %v1591_v60  ;;  %v1401_v59 = vadd.f32 %v1331_v16, %v1216_v32  ;;  %v3763_v13 = vpop.f32.mrf.mxu2 }
 0x14b   : > { %v1470_v14 = vadd.f32 %v3696_v7, %v1400_v31  ;;  %v1333_v31 = vperm.slane %v1299_v6, 1 }
 0x14c   : > { %v1471_v39 = vadd.f32 %v3698_v11, %v1401_v59 }
 0x14d   : > { %v1534_v34 = vmax.f32 %v1470_v14, 0.0 }
 0x14e   : > { %v1128_v46 = vpop.f32.mrf.mxu0  ;;  %v1535_v8 = vmax.f32 %v1471_v39, 0.0 }
 0x14f   : > { %v1217_v37 = vpop.f32.mrf.mxu1  ;;  %v1129_v27 = vadd.f32 %v1128_v46, %v3607_v23  ;;  %v3765_v23 = vpop.f32.mrf.mxu3 }
 0x150   : > { %v1218_v63 = vadd.f32 %v1217_v37, %v3609_v10 }
 0x151   : > { %v1402_v21 = vadd.f32 %v1330_v24, %v1129_v27 }
 0x152   : > { %v1403_v0 = vadd.f32 %v1331_v16, %v1218_v63  ;;  %v1332_v16 = vperm.slane %v1299_v6, 0 }
 0x153   : > { %v1472_v25 = vadd.f32 %v3696_v7, %v1402_v21 }
 0x154   : > { %v1473_v53 = vadd.f32 %v3698_v11, %v1403_v0 }
 0x155   : > { %v1536_v30 = vmax.f32 %v1472_v25, 0.0 }
 0x156   : > { %v1537_v52 = vmax.f32 %v1473_v53, 0.0  ;;  %v1131_v10 = vpop.f32.mrf.mxu0 }
 0x157   : > { %v1220_v42 = vpop.f32.mrf.mxu1  ;;  %v1592_v60 = vpack.c.bf16 %v1536_v30, %v1534_v34  ;;  %v1132_v32 = vadd.f32 %v1131_v10, %v3617_v20  ;;  %v3774_v20 = vpop.f32.mrf.mxu2  ;;  %v3043_v30 = vld [vmem:[%s3288_s20 + $0x68] sm:$0xff]  ;;  %v1302_v10 = vrot.slane %v3469_v49, 5 }
 0x158   : > { %v1593_v3 = vpack.c.bf16 %v1537_v52, %v1535_v8  ;;  %v1221_v24 = vadd.f32 %v1220_v42, %v3619_v9  ;;  %v3776_v9 = vpop.f32.mrf.mxu3 }
 0x159   : > { %2943 = vmatmul.msk.bf16.gmra.mxu0 %vm668_vm0, %v3042_v47  ;;  %1773 = vmatmul.bf16.gmra.mxu2 %v1592_v60  ;;  %v1404_v59 = vadd.f32 %v1332_v16, %v1132_v32 }
 0x15a   : > { %2959 = vmatmul.msk.bf16.gmra.mxu1 %vm668_vm0, %v3042_v47  ;;  %1862 = vmatmul.bf16.gmra.mxu3 %v1593_v3  ;;  %v1405_v46 = vadd.f32 %v1333_v31, %v1221_v24 }
 0x15b   : > { %v1474_v14 = vadd.f32 %v3696_v7, %v1404_v59 }
 0x15c   : > { %v1475_v39 = vadd.f32 %v3698_v11, %v1405_v46 }
 0x15d   : > { %v1538_v34 = vmax.f32 %v1474_v14, 0.0 }
 0x15e   : > { %v1133_v37 = vpop.f32.mrf.mxu0  ;;  %v1539_v8 = vmax.f32 %v1475_v39, 0.0 }
 0x15f   : > { %v1222_v27 = vpop.f32.mrf.mxu1  ;;  %v1134_v38 = vadd.f32 %v1133_v37, %v3636_v4  ;;  %v3788_v32 = vpop.f32.mrf.mxu2 }
 0x160   : > { %v1223_v63 = vadd.f32 %v1222_v27, %v3638_v35  ;;  %v3790_v24 = vpop.f32.mrf.mxu3 }
 0x161   : > { %v1406_v21 = vadd.f32 %v1332_v16, %v1134_v38  ;;  %v1334_v16 = vperm.slane %v1302_v10, 0 }
 0x162   : > { %v1407_v0 = vadd.f32 %v1333_v31, %v1223_v63  ;;  %v1335_v31 = vperm.slane %v1302_v10, 1 }
 0x163   : > { %v1476_v25 = vadd.f32 %v3696_v7, %v1406_v21 }
 0x164   : > { %v1477_v53 = vadd.f32 %v3698_v11, %v1407_v0 }
 0x165   : > { %v1540_v47 = vmax.f32 %v1476_v25, 0.0 }
 0x166   : > { %v1541_v4 = vmax.f32 %v1477_v53, 0.0  ;;  %v1136_v35 = vpop.f32.mrf.mxu0 }
 0x167   : > { %v1225_v52 = vpop.f32.mrf.mxu1  ;;  %v1594_v42 = vpack.c.bf16 %v1540_v47, %v1538_v34  ;;  %v1137_v60 = vadd.f32 %v1136_v35, %v3643_v57  ;;  %v3798_v0 = vpop.f32.mrf.mxu2  ;;  %v3044_v47 = vld [vmem:[%s3288_s20 + $0x70] sm:$0xff] }
 0x168   : > { %v1595_v6 = vpack.c.bf16 %v1541_v4, %v1539_v8  ;;  %v1226_v3 = vadd.f32 %v1225_v52, %v3645_v26  ;;  %v3800_v25 = vpop.f32.mrf.mxu3 }
 0x169   : > { %2944 = vmatmul.msk.bf16.gmra.mxu0 %vm668_vm0, %v3043_v30  ;;  %1778 = vmatmul.bf16.gmra.mxu2 %v1594_v42  ;;  %v1408_v59 = vadd.f32 %v1334_v16, %v1137_v60 }
 0x16a   : > { %2960 = vmatmul.msk.bf16.gmra.mxu1 %vm668_vm0, %v3043_v30  ;;  %1867 = vmatmul.bf16.gmra.mxu3 %v1595_v6  ;;  %v1409_v49 = vadd.f32 %v1335_v31, %v1226_v3  ;;  %v1305_v30 = vrot.slane %v3472_v50, 6 }
 0x16b   : > { %v1478_v27 = vadd.f32 %v3696_v7, %v1408_v59 }
 0x16c   : > { %v1479_v38 = vadd.f32 %v3698_v11, %v1409_v49  ;;  %v1336_v6 = vperm.slane %v1305_v30, 0  ;;  %v1337_v60 = vperm.slane %v1305_v30, 1 }
 0x16d   : > { %v1542_v53 = vmax.f32 %v1478_v27, 0.0 }
 0x16e   : > { %v1138_v46 = vpop.f32.mrf.mxu0  ;;  %v1543_v34 = vmax.f32 %v1479_v38, 0.0 }
 0x16f   : > { %v1227_v37 = vpop.f32.mrf.mxu1  ;;  %v1139_v57 = vadd.f32 %v1138_v46, %v3659_v19 }
 0x170   : > { %v1228_v26 = vadd.f32 %v1227_v37, %v3661_v2  ;;  %v3810_v50 = vpop.f32.mrf.mxu3 }
 0x171   : > { %v1410_v63 = vadd.f32 %v1334_v16, %v1139_v57 }
 0x172   : > { %v1411_v14 = vadd.f32 %v1335_v31, %v1228_v26  ;;  %v3808_v31 = vpop.f32.mrf.mxu2 }
 0x173   : > { %v1480_v39 = vadd.f32 %v3696_v7, %v1410_v63 }
 0x174   : > { %v1481_v21 = vadd.f32 %v3698_v11, %v1411_v14 }
 0x175   : > { %v1544_v8 = vmax.f32 %v1480_v39, 0.0 }
 0x176   : > { %v1545_v19 = vmax.f32 %v1481_v21, 0.0  ;;  %v1141_v2 = vpop.f32.mrf.mxu0 }
 0x177   : > { %v1230_v4 = vpop.f32.mrf.mxu1  ;;  %v1596_v35 = vpack.c.bf16 %v1544_v8, %v1542_v53  ;;  %v1142_v10 = vadd.f32 %v1141_v2, %v3668_v43  ;;  %v3045_v53 = vld [vmem:[%s3288_s20 + $0x78] sm:$0xff] }
 0x178   : > { %v1597_v52 = vpack.c.bf16 %v1545_v19, %v1543_v34  ;;  %v1231_v42 = vadd.f32 %v1230_v4, %v3670_v41  ;;  %v1308_v19 = vrot.slane %v3475_v51, 7  ;;  %v3128_v51 = vmov 0  }
 0x179   : > { %2945 = vmatmul.msk.bf16.gmra.mxu0 %vm668_vm0, %v3044_v47  ;;  %1783 = vmatmul.bf16.gmra.mxu2 %v1596_v35  ;;  %v1412_v3 = vadd.f32 %v1336_v6, %v1142_v10 }
 0x17a   : > { %2961 = vmatmul.msk.bf16.gmra.mxu1 %vm668_vm0, %v3044_v47  ;;  %1872 = vmatmul.bf16.gmra.mxu3 %v1597_v52  ;;  %v1413_v16 = vadd.f32 %v1337_v60, %v1231_v42  ;;  %v1338_v35 = vperm.slane %v1308_v19, 0  ;;  %v1339_v52 = vperm.slane %v1308_v19, 1  ;;  %v1340_v19 = vperm.slane %v3480_v55, 0 }
 0x17b   : > { %v1482_v46 = vadd.f32 %v3696_v7, %v1412_v3  ;;  %3087 = vset.pattern.permute.xlu2 %v3128_v51  ;;  %3088 = vset.pattern.permute.xlu0 %v3128_v51 }
 0x17c   : > { %v1483_v37 = vadd.f32 %v3698_v11, %v1413_v16  ;;  %3089 = vset.pattern.permute.xlu1 %v3128_v51 }
 0x17d   : > { %v1546_v63 = vmax.f32 %v1482_v46, 0.0 }
 0x17e   : > { %v1143_v59 = vpop.f32.mrf.mxu0  ;;  %v1547_v14 = vmax.f32 %v1483_v37, 0.0 }
 0x17f   : > { %v1232_v49 = vpop.f32.mrf.mxu1  ;;  %v1144_v43 = vadd.f32 %v1143_v59, %v3674_v22  ;;  %v3819_v22 = vpop.f32.mrf.mxu2 }
 0x180   : > { %v1233_v41 = vadd.f32 %v1232_v49, %v3676_v45  ;;  %v3821_v45 = vpop.f32.mrf.mxu3 }
 0x181   : > { %v1414_v57 = vadd.f32 %v1336_v6, %v1144_v43  ;;  %v3109_v6 = vld [vmem:[#allocation2] ss:$0 sm:$0xff] }
 0x182   : > { %v1415_v26 = vadd.f32 %v1337_v60, %v1233_v41  ;;  %2064 = vperm.xlu2 %3087, %v3109_v6  }
 0x183   : > { %v1484_v27 = vadd.f32 %v3696_v7, %v1414_v57 }
 0x184   : > { %v1485_v38 = vadd.f32 %v3698_v11, %v1415_v26 }
 0x185   : > { %v1548_v39 = vmax.f32 %v1484_v27, 0.0 }
 0x186   : > { %v1549_v21 = vmax.f32 %v1485_v38, 0.0  ;;  %v1146_v34 = vpop.f32.mrf.mxu0 }
 0x187   : > { %v1235_v8 = vpop.f32.mrf.mxu1  ;;  %v1598_v47 = vpack.c.bf16 %v1548_v39, %v1546_v63  ;;  %v1147_v4 = vadd.f32 %v1146_v34, %v3649_v28  ;;  %v3832_v49 = vpop.f32.mrf.mxu2 }
 0x188   : > { %v1599_v2 = vpack.c.bf16 %v1549_v21, %v1547_v14  ;;  %v1236_v30 = vadd.f32 %v1235_v8, %v3651_v54  ;;  %v3834_v43 = vpop.f32.mrf.mxu3 }
 0x189   : > { %2946 = vmatmul.msk.bf16.gmra.mxu0 %vm668_vm0, %v3045_v53  ;;  %1788 = vmatmul.bf16.gmra.mxu2 %v1598_v47  ;;  %v1416_v10 = vadd.f32 %v1338_v35, %v1147_v4  ;;  %v1341_v47 = vperm.slane %v3480_v55, 1 }
 0x18a   : > { %2962 = vmatmul.msk.bf16.gmra.mxu1 %vm668_vm0, %v3045_v53  ;;  %1877 = vmatmul.bf16.gmra.mxu3 %v1599_v2  ;;  %v1417_v42 = vadd.f32 %v1339_v52, %v1236_v30 }
 0x18b   : > { %v1486_v16 = vadd.f32 %v3696_v7, %v1416_v10 }
 0x18c   : > { %v1487_v59 = vadd.f32 %v3698_v11, %v1417_v42 }
 0x18d   : > { %v1550_v26 = vmax.f32 %v1486_v16, 0.0 }
 0x18e   : > { %v1148_v60 = vpop.f32.mrf.mxu0 }
 0x18f   : > { %v1237_v3 = vpop.f32.mrf.mxu1  ;;  %v1149_v28 = vadd.f32 %v1148_v60, %v3664_v44  ;;  %v1551_v44 = vmax.f32 %v1487_v59, 0.0  ;;  %v3840_v34 = vpop.f32.mrf.mxu2 }
 0x190   : > { %v1238_v54 = vadd.f32 %v1237_v3, %v3666_v36  ;;  %v3842_v8 = vpop.f32.mrf.mxu3 }
 0x191   : > { %v1418_v41 = vadd.f32 %v1338_v35, %v1149_v28 }
 0x192   : > { %v1419_v46 = vadd.f32 %v1339_v52, %v1238_v54 }
 0x193   : > { %v1488_v37 = vadd.f32 %v3696_v7, %v1418_v41  ;;  %v1311_v41 = vrot.slane %v3483_v56, 1 }
 0x194   : > { %v1489_v57 = vadd.f32 %v3698_v11, %v1419_v46 }
 0x195   : > { %v1552_v27 = vmax.f32 %v1488_v37, 0.0 }
 0x196   : > { %v1553_v36 = vmax.f32 %v1489_v57, 0.0  ;;  %v1151_v38 = vpop.f32.mrf.mxu0 }
 0x197   : > { %v1240_v63 = vpop.f32.mrf.mxu1  ;;  %v1600_v14 = vpack.c.bf16 %v1552_v27, %v1550_v26  ;;  %v1152_v21 = vadd.f32 %v1151_v38, %v3678_v62  ;;  %v3852_v28 = vpop.f32.mrf.mxu2  ;;  %v1342_v27 = vperm.slane %v1311_v41, 0 }
 0x198   : > { %v1601_v39 = vpack.c.bf16 %v1553_v36, %v1551_v44  ;;  %v1241_v53 = vadd.f32 %v1240_v63, %v3680_v58  ;;  %v3854_v54 = vpop.f32.mrf.mxu3  ;;  %v3862_v44 = vld [vmem:[%s4281_s8] ss:$0 sm:$0xff]  ;;  %v1343_v36 = vperm.slane %v1311_v41, 1 }
 0x199   : > { %1793 = vmatmul.bf16.gmra.mxu2 %v1600_v14  ;;  %v1420_v2 = vadd.f32 %v1340_v19, %v1152_v21 }
 0x19a   : > { %1882 = vmatmul.bf16.gmra.mxu3 %v1601_v39  ;;  %v1421_v4 = vadd.f32 %v1341_v47, %v1241_v53 }
 0x19b   : > { %v1490_v58 = vadd.f32 %v3696_v7, %v1420_v2  ;;  %v3870_v2 = vld [vmem:[%s4282_s9] ss:$0 sm:$0xff] }
 0x19c   : > { %v1491_v10 = vadd.f32 %v3698_v11, %v1421_v4 }
 0x19d   : > { %v1554_v51 = vmax.f32 %v1490_v58, 0.0 }
 0x19e   : > { %v1153_v30 = vpop.f32.mrf.mxu0  ;;  %v1555_v55 = vmax.f32 %v1491_v10, 0.0 }
 0x19f   : > { %v1242_v35 = vpop.f32.mrf.mxu1  ;;  %v1154_v52 = vadd.f32 %v1153_v30, %v3687_v29 }
 0x1a0   : > { %v1243_v62 = vadd.f32 %v1242_v35, %v3689_v33 }
 0x1a1   : > { %v1422_v42 = vadd.f32 %v1340_v19, %v1154_v52 }
 0x1a2   : > { %v1423_v6 = vadd.f32 %v1341_v47, %v1243_v62 }
 0x1a3   : > { %v1492_v60 = vadd.f32 %v3696_v7, %v1422_v42 }
 0x1a4   : > { %v1493_v3 = vadd.f32 %v3698_v11, %v1423_v6 }
 0x1a5   : > { %v1556_v16 = vmax.f32 %v1492_v60, 0.0 }
 0x1a6   : > { %v1557_v29 = vmax.f32 %v1493_v3, 0.0  ;;  %v1156_v59 = vpop.f32.mrf.mxu0 }
 0x1a7   : > { %v1245_v33 = vpop.f32.mrf.mxu1  ;;  %v1602_v46 = vpack.c.bf16 %v1556_v16, %v1554_v51  ;;  %v1157_v57 = vadd.f32 %v1156_v59, %v3706_v61 }
 0x1a8   : > { %v1603_v37 = vpack.c.bf16 %v1557_v29, %v1555_v55  ;;  %v1246_v26 = vadd.f32 %v1245_v33, %v3708_v17  ;;  %v4373_v17 = vld [vmem:[#allocation25_spill] sm:$0xff]  ;;  %v4374_v33 = vld [vmem:[#allocation14_spill] sm:$0xff] }
 0x1a9   : > { %1798 = vmatmul.bf16.gmra.mxu2 %v1602_v46  ;;  %v1424_v38 = vadd.f32 %v1342_v27, %v1157_v57  ;;  %v1313_v41 = vrot.slane %v4374_v33, 2 }
 0x1aa   : > { %1887 = vmatmul.bf16.gmra.mxu3 %v1603_v37  ;;  %v1425_v63 = vadd.f32 %v1343_v36, %v1246_v26 }
 0x1ab   : > { %v1494_v4 = vadd.f32 %v3696_v7, %v1424_v38  ;;  %v1344_v38 = vperm.slane %v1313_v41, 0 }
 0x1ac   : > { %v1759_v14 = vpop.f32.mrf.mxu2  ;;  %v1495_v30 = vadd.f32 %v3698_v11, %v1425_v63  ;;  %v1345_v63 = vperm.slane %v1313_v41, 1 }
 0x1ad   : > { %v1848_v39 = vpop.f32.mrf.mxu3  ;;  %v1760_v56 = vadd.f32 %v3862_v44, %v1759_v14  ;;  %v1558_v42 = vmax.f32 %v1494_v4, 0.0 }
 0x1ae   : > { %v1158_v21 = vpop.f32.mrf.mxu0  ;;  %v1559_v6 = vmax.f32 %v1495_v30, 0.0 }
 0x1af   : > { %v1247_v53 = vpop.f32.mrf.mxu1  ;;  %v1159_v61 = vadd.f32 %v1158_v21, %v3716_v12  ;;  %v1849_v47 = vadd.f32 %v1848_v39, %v1760_v56 }
 0x1b0   : > { %v1248_v19 = vadd.f32 %v1247_v53, %v4373_v17 }
 0x1b1   : > { %v1426_v35 = vadd.f32 %v1342_v27, %v1159_v61  ;;  %v1928_v62 = vmax.f32 %v1849_v47, 0.0 }
 0x1b2   : > { %v1427_v52 = vadd.f32 %v1343_v36, %v1248_v19 }
 0x1b3   : > { %v1496_v58 = vadd.f32 %v3696_v7, %v1426_v35  ;;  %v1964_v12 = vmul.f32 %v3870_v2, %v1928_v62 }
 0x1b4   : > { %v1497_v10 = vadd.f32 %v3698_v11, %v1427_v52  ;;  %v1761_v51 = vpop.f32.mrf.mxu2 }
 0x1b5   : > { %v1560_v60 = vmax.f32 %v1496_v58, 0.0  ;;  %v1850_v55 = vpop.f32.mrf.mxu3  ;;  %v1762_v16 = vadd.f32 %v3862_v44, %v1761_v51  ;;  %1996 = vadd.xlane.f32.xlu0 %v1964_v12 }
 0x1b6   : > { %v1561_v3 = vmax.f32 %v1497_v10, 0.0  ;;  %v1161_v29 = vpop.f32.mrf.mxu0 }
 0x1b7   : > { %v1250_v59 = vpop.f32.mrf.mxu1  ;;  %v1604_v46 = vpack.c.bf16 %v1560_v60, %v1558_v42  ;;  %v1851_v57 = vadd.f32 %v1850_v55, %v1762_v16  ;;  %v1162_v26 = vadd.f32 %v1161_v29, %v3728_v15  ;;  %v4375_v29 = vld [vmem:[#allocation15_spill] sm:$0xff] }
 0x1b8   : > { %v1605_v37 = vpack.c.bf16 %v1561_v3, %v1559_v6  ;;  %v1251_v27 = vadd.f32 %v1250_v59, %v3730_v5  ;;  %v1315_v59 = vrot.slane %v4375_v29, 3 }
 0x1b9   : > { %v1929_v36 = vmax.f32 %v1851_v57, 0.0  ;;  %1803 = vmatmul.bf16.gmra.mxu2 %v1604_v46  ;;  %v1428_v39 = vadd.f32 %v1344_v38, %v1162_v26 }
 0x1ba   : > { %1892 = vmatmul.bf16.gmra.mxu3 %v1605_v37  ;;  %v1429_v56 = vadd.f32 %v1345_v63, %v1251_v27  ;;  %v1346_v27 = vperm.slane %v1315_v59, 0 }
 0x1bb   : > { %v1965_v14 = vmul.f32 %v3870_v2, %v1929_v36  ;;  %v1498_v4 = vadd.f32 %v3696_v7, %v1428_v39  ;;  %v1347_v36 = vperm.slane %v1315_v59, 1 }
 0x1bc   : > { %v1764_v21 = vpop.f32.mrf.mxu2  ;;  %v1499_v30 = vadd.f32 %v3698_v11, %v1429_v56 }
 0x1bd   : > { %v1853_v53 = vpop.f32.mrf.mxu3  ;;  %v1765_v61 = vadd.f32 %v3862_v44, %v1764_v21  ;;  %1998 = vadd.xlane.f32.xlu0 %v1965_v14  ;;  %v1562_v42 = vmax.f32 %v1498_v4, 0.0 }
 0x1be   : > { %v1163_v17 = vpop.f32.mrf.mxu0  ;;  %v1563_v6 = vmax.f32 %v1499_v30, 0.0 }
 0x1bf   : > { %v1252_v19 = vpop.f32.mrf.mxu1  ;;  %v1164_v15 = vadd.f32 %v1163_v17, %v3740_v48  ;;  %v1854_v47 = vadd.f32 %v1853_v53, %v1765_v61 }
 0x1c0   : > { %v1253_v5 = vadd.f32 %v1252_v19, %v3742_v1 }
 0x1c1   : > { %v1430_v35 = vadd.f32 %v1344_v38, %v1164_v15  ;;  %v1930_v62 = vmax.f32 %v1854_v47, 0.0 }
 0x1c2   : > { %v1431_v52 = vadd.f32 %v1345_v63, %v1253_v5 }
 0x1c3   : > { %v1500_v58 = vadd.f32 %v3696_v7, %v1430_v35  ;;  %v1966_v12 = vmul.f32 %v3870_v2, %v1930_v62 }
 0x1c4   : > { %v1501_v10 = vadd.f32 %v3698_v11, %v1431_v52  ;;  %v1766_v3 = vpop.f32.mrf.mxu2 }
 0x1c5   : > { %v1564_v60 = vmax.f32 %v1500_v58, 0.0  ;;  %v1855_v1 = vpop.f32.mrf.mxu3  ;;  %v1767_v51 = vadd.f32 %v3862_v44, %v1766_v3  ;;  %2000 = vadd.xlane.f32.xlu1 %v1966_v12 }
 0x1c6   : > { %v1565_v48 = vmax.f32 %v1501_v10, 0.0  ;;  %v1166_v55 = vpop.f32.mrf.mxu0 }
 0x1c7   : > { %v1255_v16 = vpop.f32.mrf.mxu1  ;;  %v1606_v33 = vpack.c.bf16 %v1564_v60, %v1562_v42  ;;  %v1856_v46 = vadd.f32 %v1855_v1, %v1767_v51  ;;  %v1167_v37 = vadd.f32 %v1166_v55, %v3752_v40 }
 0x1c8   : > { %v1607_v41 = vpack.c.bf16 %v1565_v48, %v1563_v6  ;;  %v1256_v57 = vadd.f32 %v1255_v16, %v3754_v18  ;;  %v4376_v48 = vld [vmem:[#allocation16_spill] sm:$0xff] }
 0x1c9   : > { %v1931_v26 = vmax.f32 %v1856_v46, 0.0  ;;  %1808 = vmatmul.bf16.gmra.mxu2 %v1606_v33  ;;  %v1432_v63 = vadd.f32 %v1346_v27, %v1167_v37  ;;  %v1317_v3 = vrot.slane %v4376_v48, 4 }
 0x1ca   : > { %1897 = vmatmul.bf16.gmra.mxu3 %v1607_v41  ;;  %v1433_v14 = vadd.f32 %v1347_v36, %v1256_v57 }
 0x1cb   : > { %v1967_v38 = vmul.f32 %v3870_v2, %v1931_v26  ;;  %v1502_v19 = vadd.f32 %v3696_v7, %v1432_v63  ;;  %v1348_v33 = vperm.slane %v1317_v3, 0  ;;  %v1349_v41 = vperm.slane %v1317_v3, 1 }
 0x1cc   : > { %v1769_v39 = vpop.f32.mrf.mxu2  ;;  %v1503_v15 = vadd.f32 %v3698_v11, %v1433_v14 }
 0x1cd   : > { %v1858_v56 = vpop.f32.mrf.mxu3  ;;  %v1770_v21 = vadd.f32 %v3862_v44, %v1769_v39  ;;  %2002 = vadd.xlane.f32.xlu1 %v1967_v38  ;;  %v1566_v62 = vmax.f32 %v1502_v19, 0.0 }
 0x1ce   : > { %v1168_v53 = vpop.f32.mrf.mxu0  ;;  %v1567_v58 = vmax.f32 %v1503_v15, 0.0 }
 0x1cf   : > { %v1257_v61 = vpop.f32.mrf.mxu1  ;;  %v1169_v40 = vadd.f32 %v1168_v53, %v3763_v13  ;;  %v1859_v17 = vadd.f32 %v1858_v56, %v1770_v21 }
 0x1d0   : > { %v1258_v18 = vadd.f32 %v1257_v61, %v3765_v23 }
 0x1d1   : > { %v1434_v5 = vadd.f32 %v1346_v27, %v1169_v40  ;;  %v1932_v4 = vmax.f32 %v1859_v17, 0.0 }
 0x1d2   : > { %v1435_v47 = vadd.f32 %v1347_v36, %v1258_v18 }
 0x1d3   : > { %v1504_v30 = vadd.f32 %v3696_v7, %v1434_v5  ;;  %v1968_v52 = vmul.f32 %v3870_v2, %v1932_v4 }
 0x1d4   : > { %v1505_v35 = vadd.f32 %v3698_v11, %v1435_v47  ;;  %v1771_v12 = vpop.f32.mrf.mxu2 }
 0x1d5   : > { %v1568_v10 = vmax.f32 %v1504_v30, 0.0  ;;  %v1860_v23 = vpop.f32.mrf.mxu3  ;;  %v1772_v42 = vadd.f32 %v3862_v44, %v1771_v12  ;;  %2004 = vadd.xlane.f32.xlu2 %v1968_v52  ;;  %v4377_v52 = vld [vmem:[#allocation17_spill] sm:$0xff] }
 0x1d6   : > { %v1569_v13 = vmax.f32 %v1505_v35, 0.0  ;;  %v1171_v6 = vpop.f32.mrf.mxu0 }
 0x1d7   : > { %v1260_v60 = vpop.f32.mrf.mxu1  ;;  %v1608_v1 = vpack.c.bf16 %v1568_v10, %v1566_v62  ;;  %v1861_v55 = vadd.f32 %v1860_v23, %v1772_v42  ;;  %v1172_v16 = vadd.f32 %v1171_v6, %v3774_v20  ;;  %v1319_v62 = vrot.slane %v4377_v52, 5 }
 0x1d8   : > { %v1609_v51 = vpack.c.bf16 %v1569_v13, %v1567_v58  ;;  %v1261_v29 = vadd.f32 %v1260_v60, %v3776_v9 }
 0x1d9   : > { %v1933_v59 = vmax.f32 %v1861_v55, 0.0  ;;  %1813 = vmatmul.bf16.gmra.mxu2 %v1608_v1  ;;  %v1436_v37 = vadd.f32 %v1348_v33, %v1172_v16  ;;  %v1350_v6 = vperm.slane %v1319_v62, 0  ;;  %v1351_v60 = vperm.slane %v1319_v62, 1 }
 0x1da   : > { %1902 = vmatmul.bf16.gmra.mxu3 %v1609_v51  ;;  %v1437_v57 = vadd.f32 %v1349_v41, %v1261_v29 }
 0x1db   : > { %v1969_v46 = vmul.f32 %v3870_v2, %v1933_v59  ;;  %v1506_v39 = vadd.f32 %v3696_v7, %v1436_v37 }
 0x1dc   : > { %v1774_v26 = vpop.f32.mrf.mxu2  ;;  %v1507_v56 = vadd.f32 %v3698_v11, %v1437_v57 }
 0x1dd   : > { %v1863_v27 = vpop.f32.mrf.mxu3  ;;  %v1775_v36 = vadd.f32 %v3862_v44, %v1774_v26  ;;  %2006 = vadd.xlane.f32.xlu2 %v1969_v46  ;;  %v1570_v19 = vmax.f32 %v1506_v39, 0.0 }
 0x1de   : > { %v1173_v38 = vpop.f32.mrf.mxu0  ;;  %v1571_v15 = vmax.f32 %v1507_v56, 0.0 }
 0x1df   : > { %v1262_v63 = vpop.f32.mrf.mxu1  ;;  %v1174_v20 = vadd.f32 %v1173_v38, %v3788_v32  ;;  %v1864_v14 = vadd.f32 %v1863_v27, %v1775_v36 }
 0x1e0   : > { %v1263_v9 = vadd.f32 %v1262_v63, %v3790_v24 }
 0x1e1   : > { %v1438_v21 = vadd.f32 %v1348_v33, %v1174_v20  ;;  %v1934_v61 = vmax.f32 %v1864_v14, 0.0 }
 0x1e2   : > { %v1439_v53 = vadd.f32 %v1349_v41, %v1263_v9 }
 0x1e3   : > { %v1508_v40 = vadd.f32 %v3696_v7, %v1438_v21  ;;  %v1970_v17 = vmul.f32 %v3870_v2, %v1934_v61 }
 0x1e4   : > { %v1509_v18 = vadd.f32 %v3698_v11, %v1439_v53  ;;  %v1776_v47 = vpop.f32.mrf.mxu2  ;;  %v4378_v53 = vld [vmem:[#allocation18_spill] sm:$0xff] }
 0x1e5   : > { %v1572_v5 = vmax.f32 %v1508_v40, 0.0  ;;  %v1865_v24 = vpop.f32.mrf.mxu3  ;;  %v1777_v4 = vadd.f32 %v3862_v44, %v1776_v47  ;;  %2008 = vadd.xlane.f32.xlu0 %v1970_v17  ;;  %v1321_v61 = vrot.slane %v4378_v53, 6 }
 0x1e6   : > { %v1573_v32 = vmax.f32 %v1509_v18, 0.0  ;;  %v1176_v30 = vpop.f32.mrf.mxu0 }
 0x1e7   : > { %v1265_v35 = vpop.f32.mrf.mxu1  ;;  %v1610_v58 = vpack.c.bf16 %v1572_v5, %v1570_v19  ;;  %v1866_v13 = vadd.f32 %v1865_v24, %v1777_v4  ;;  %v1177_v12 = vadd.f32 %v1176_v30, %v3798_v0  ;;  %v1353_v47 = vperm.slane %v1321_v61, 1 }
 0x1e8   : > { %v1611_v10 = vpack.c.bf16 %v1573_v32, %v1571_v15  ;;  %v1266_v23 = vadd.f32 %v1265_v35, %v3800_v25  ;;  %v1352_v32 = vperm.slane %v1321_v61, 0 }
 0x1e9   : > { %v1935_v42 = vmax.f32 %v1866_v13, 0.0  ;;  %1818 = vmatmul.bf16.gmra.mxu2 %v1610_v58  ;;  %v1440_v3 = vadd.f32 %v1350_v6, %v1177_v12 }
 0x1ea   : > { %1907 = vmatmul.bf16.gmra.mxu3 %v1611_v10  ;;  %v1441_v1 = vadd.f32 %v1351_v60, %v1266_v23 }
 0x1eb   : > { %v1971_v48 = vmul.f32 %v3870_v2, %v1935_v42  ;;  %v1510_v41 = vadd.f32 %v3696_v7, %v1440_v3 }
 0x1ec   : > { %v1779_v51 = vpop.f32.mrf.mxu2  ;;  %v1511_v46 = vadd.f32 %v3698_v11, %v1441_v1 }
 0x1ed   : > { %v1868_v55 = vpop.f32.mrf.mxu3  ;;  %v1780_v16 = vadd.f32 %v3862_v44, %v1779_v51  ;;  %2010 = vadd.xlane.f32.xlu1 %v1971_v48  ;;  %v1574_v63 = vmax.f32 %v1510_v41, 0.0 }
 0x1ee   : > { %v1178_v29 = vpop.f32.mrf.mxu0  ;;  %v1575_v20 = vmax.f32 %v1511_v46, 0.0 }
 0x1ef   : > { %v1267_v59 = vpop.f32.mrf.mxu1  ;;  %v1179_v0 = vadd.f32 %v1178_v29, %v3808_v31  ;;  %v1869_v33 = vadd.f32 %v1868_v55, %v1780_v16 }
 0x1f0   : > { %v1268_v25 = vadd.f32 %v1267_v59, %v3810_v50 }
 0x1f1   : > { %v1442_v37 = vadd.f32 %v1350_v6, %v1179_v0  ;;  %v1936_v26 = vmax.f32 %v1869_v33, 0.0  ;;  %v4379_v33 = vld [vmem:[#allocation19_spill] sm:$0xff] }
 0x1f2   : > { %v1443_v57 = vadd.f32 %v1351_v60, %v1268_v25  ;;  %v1323_v41 = vrot.slane %v4379_v33, 7 }
 0x1f3   : > { %v1512_v27 = vadd.f32 %v3696_v7, %v1442_v37  ;;  %v1972_v38 = vmul.f32 %v3870_v2, %v1936_v26 }
 0x1f4   : > { %v1513_v36 = vadd.f32 %v3698_v11, %v1443_v57  ;;  %v1781_v14 = vpop.f32.mrf.mxu2 }
 0x1f5   : > { %v1576_v9 = vmax.f32 %v1512_v27, 0.0  ;;  %v1870_v50 = vpop.f32.mrf.mxu3  ;;  %v1782_v39 = vadd.f32 %v3862_v44, %v1781_v14  ;;  %2012 = vadd.xlane.f32.xlu2 %v1972_v38  ;;  %v1354_v38 = vperm.slane %v1323_v41, 0 }
 0x1f6   : > { %v1577_v31 = vmax.f32 %v1513_v36, 0.0  ;;  %v1181_v56 = vpop.f32.mrf.mxu0 }
 0x1f7   : > { %v1270_v21 = vpop.f32.mrf.mxu1  ;;  %v1612_v40 = vpack.c.bf16 %v1576_v9, %v1574_v63  ;;  %v1871_v17 = vadd.f32 %v1870_v50, %v1782_v39  ;;  %v1182_v19 = vadd.f32 %v1181_v56, %v3819_v22  ;;  %v1355_v63 = vperm.slane %v1323_v41, 1 }
 0x1f8   : > { %v1613_v18 = vpack.c.bf16 %v1577_v31, %v1575_v20  ;;  %v1271_v15 = vadd.f32 %v1270_v21, %v3821_v45 }
 0x1f9   : > { %v1937_v5 = vmax.f32 %v1871_v17, 0.0  ;;  %1823 = vmatmul.bf16.gmra.mxu2 %v1612_v40  ;;  %v1444_v4 = vadd.f32 %v1352_v32, %v1182_v19 }
 0x1fa   : > { %1912 = vmatmul.bf16.gmra.mxu3 %v1613_v18  ;;  %v1445_v30 = vadd.f32 %v1353_v47, %v1271_v15 }
 0x1fb   : > { %v1973_v24 = vmul.f32 %v3870_v2, %v1937_v5  ;;  %v1514_v12 = vadd.f32 %v3696_v7, %v1444_v4 }
 0x1fc   : > { %v1784_v35 = vpop.f32.mrf.mxu2  ;;  %v1515_v23 = vadd.f32 %v3698_v11, %v1445_v30 }
 0x1fd   : > { %v1873_v52 = vpop.f32.mrf.mxu3  ;;  %v1785_v62 = vadd.f32 %v3862_v44, %v1784_v35  ;;  %2014 = vadd.xlane.f32.xlu0 %v1973_v24  ;;  %v1578_v51 = vmax.f32 %v1514_v12, 0.0 }
 0x1fe   : > { %v1183_v58 = vpop.f32.mrf.mxu0  ;;  %v1579_v55 = vmax.f32 %v1515_v23, 0.0 }
 0x1ff   : > { %v1272_v10 = vpop.f32.mrf.mxu1  ;;  %v1184_v22 = vadd.f32 %v1183_v58, %v3832_v49  ;;  %v1874_v13 = vadd.f32 %v1873_v52, %v1785_v62 }
 0x200   : > { %v1273_v45 = vadd.f32 %v1272_v10, %v3834_v43 }
 0x201   : > { %v1446_v42 = vadd.f32 %v1352_v32, %v1184_v22  ;;  %v1938_v60 = vmax.f32 %v1874_v13, 0.0 }
 0x202   : > { %v1447_v6 = vadd.f32 %v1353_v47, %v1273_v45 }
 0x203   : > { %v1516_v48 = vadd.f32 %v3696_v7, %v1446_v42  ;;  %v1974_v1 = vmul.f32 %v3870_v2, %v1938_v60 }
 0x204   : > { %v1517_v3 = vadd.f32 %v3698_v11, %v1447_v6  ;;  %v1786_v29 = vpop.f32.mrf.mxu2 }
 0x205   : > { %v1580_v16 = vmax.f32 %v1516_v48, 0.0  ;;  %v1875_v43 = vpop.f32.mrf.mxu3  ;;  %v1787_v59 = vadd.f32 %v3862_v44, %v1786_v29  ;;  %2016 = vadd.xlane.f32.xlu1 %v1974_v1 }
 0x206   : > { %v1581_v49 = vmax.f32 %v1517_v3, 0.0  ;;  %v1186_v0 = vpop.f32.mrf.mxu0 }
 0x207   : > { %v1275_v25 = vpop.f32.mrf.mxu1  ;;  %v1614_v46 = vpack.c.bf16 %v1580_v16, %v1578_v51  ;;  %v1876_v57 = vadd.f32 %v1875_v43, %v1787_v59  ;;  %v1187_v26 = vadd.f32 %v1186_v0, %v3840_v34  ;;  %v2099_v51 = vlaneseq }
 0x208   : > { %v1615_v37 = vpack.c.bf16 %v1581_v49, %v1579_v55  ;;  %v1276_v27 = vadd.f32 %v1275_v25, %v3842_v8  ;;  %v3960_v55 = vpop.permute.xlu2 %2064 }
 0x209   : > { %v1939_v36 = vmax.f32 %v1876_v57, 0.0  ;;  %1828 = vmatmul.bf16.gmra.mxu2 %v1614_v46  ;;  %v1448_v9 = vadd.f32 %v1354_v38, %v1187_v26  ;;  %v3964_v43 = vand.u32 127, %v2099_v51 }
 0x20a   : > { %1917 = vmatmul.bf16.gmra.mxu3 %v1615_v37  ;;  %v1449_v31 = vadd.f32 %v1355_v63, %v1276_v27 }
 0x20b   : > { %v1975_v20 = vmul.f32 %v3870_v2, %v1939_v36  ;;  %v1518_v61 = vadd.f32 %v3696_v7, %v1448_v9  ;;  %v3969_v33 = vadd.s32 4294967288, %v3964_v43 }
 0x20c   : > { %v1789_v14 = vpop.f32.mrf.mxu2  ;;  %v1519_v40 = vadd.f32 %v3698_v11, %v1449_v31 }
 0x20d   : > { %v1878_v50 = vpop.f32.mrf.mxu3  ;;  %v1790_v39 = vadd.f32 %v3862_v44, %v1789_v14  ;;  %2018 = vadd.xlane.f32.xlu2 %v1975_v20  ;;  %v1582_v47 = vmax.f32 %v1518_v61, 0.0 }
 0x20e   : > { %v1188_v56 = vpop.f32.mrf.mxu0  ;;  %v1583_v24 = vmax.f32 %v1519_v40, 0.0 }
 0x20f   : > { %v1277_v21 = vpop.f32.mrf.mxu1  ;;  %v1189_v34 = vadd.f32 %v1188_v56, %v3852_v28  ;;  %v1879_v53 = vadd.f32 %v1878_v50, %v1790_v39 }
 0x210   : > { %v1278_v8 = vadd.f32 %v1277_v21, %v3854_v54 }
 0x211   : > { %v1450_v18 = vadd.f32 %v1354_v38, %v1189_v34  ;;  %v1940_v19 = vmax.f32 %v1879_v53, 0.0 }
 0x212   : > { %v1451_v17 = vadd.f32 %v1355_v63, %v1278_v8 }
 0x213   : > { %v1520_v15 = vadd.f32 %v3696_v7, %v1450_v18  ;;  %v1976_v32 = vmul.f32 %v3870_v2, %v1940_v19 }
 0x214   : > { %v1521_v5 = vadd.f32 %v3698_v11, %v1451_v17  ;;  %v1791_v30 = vpop.f32.mrf.mxu2 }
 0x215   : > { %v1584_v4 = vmax.f32 %v1520_v15, 0.0  ;;  %v1880_v54 = vpop.f32.mrf.mxu3  ;;  %v1792_v35 = vadd.f32 %v3862_v44, %v1791_v30  ;;  %2020 = vadd.xlane.f32.xlu0 %v1976_v32 }
 0x216   : > { %v1585_v28 = vmax.f32 %v1521_v5, 0.0 }
 0x217   : > { %v1616_v52 = vpack.c.bf16 %v1584_v4, %v1582_v47  ;;  %v1881_v58 = vadd.f32 %v1880_v54, %v1792_v35 }
 0x218   : > { %v1617_v62 = vpack.c.bf16 %v1585_v28, %v1583_v24 }
 0x219   : > { %v1941_v10 = vmax.f32 %v1881_v58, 0.0  ;;  %1833 = vmatmul.bf16.gmra.mxu2 %v1616_v52 }
 0x21a   : > { %1922 = vmatmul.bf16.gmra.mxu3 %v1617_v62 }
 0x21b   : > { %v1977_v7 = vmul.f32 %v3870_v2, %v1941_v10 }
 0x21c   : > { %v1794_v11 = vpop.f32.mrf.mxu2 }
 0x21d   : > { %v1883_v22 = vpop.f32.mrf.mxu3  ;;  %v1795_v45 = vadd.f32 %v3862_v44, %v1794_v11  ;;  %2022 = vadd.xlane.f32.xlu1 %v1977_v7 }
 0x21f   : > { %v1884_v13 = vadd.f32 %v1883_v22, %v1795_v45 }
 0x221   : > { %v1942_v12 = vmax.f32 %v1884_v13, 0.0 }
 0x223   : > { %v1978_v23 = vmul.f32 %v3870_v2, %v1942_v12 }
 0x224   : > { %v1796_v42 = vpop.f32.mrf.mxu2 }
 0x225   : > { %v1885_v6 = vpop.f32.mrf.mxu3  ;;  %v1797_v60 = vadd.f32 %v3862_v44, %v1796_v42  ;;  %2024 = vadd.xlane.f32.xlu2 %v1978_v23 }
 0x227   : > { %v1886_v48 = vadd.f32 %v1885_v6, %v1797_v60 }
 0x228   : > { %v1997_v3 = vpop.xlane.xlu0 %1996 }
 0x229   : > { %v1943_v1 = vmax.f32 %v1886_v48, 0.0  ;;  %v2067_v0 = vadd.f32 %v3960_v55, %v1997_v3 }
 0x22b   : > { %v1979_v16 = vmul.f32 %v3870_v2, %v1943_v1  ;;  %v2143_v57 = vperm.slane %v2067_v0, %v3964_v43 }
 0x22c   : > { %v1799_v49 = vpop.f32.mrf.mxu2 }
 0x22d   : > { %v1888_v29 = vpop.f32.mrf.mxu3  ;;  %v1800_v59 = vadd.f32 %v3862_v44, %v1799_v49  ;;  %2026 = vadd.xlane.f32.xlu0 %v1979_v16 }
 0x22f   : > { %v1889_v25 = vadd.f32 %v1888_v29, %v1800_v59 }
 0x230   : > { %v1999_v41 = vpop.xlane.xlu0 %1998 }
 0x231   : > { %v1944_v46 = vmax.f32 %v1889_v25, 0.0  ;;  %v2068_v37 = vadd.f32 %v3960_v55, %v1999_v41 }
 0x233   : > { %v2145_v26 = vperm.slane %v2068_v37, %v3969_v33  ;;  %v1980_v27 = vmul.f32 %v3870_v2, %v1944_v46 }
 0x234   : > { %v1801_v36 = vpop.f32.mrf.mxu2 }
 0x235   : > { %v1890_v38 = vpop.f32.mrf.mxu3  ;;  %v2147_v63 = vsel %vm2146_vm9, %v2145_v26, %v2143_v57  ;;  %v1802_v20 = vadd.f32 %v3862_v44, %v1801_v36  ;;  %2028 = vadd.xlane.f32.xlu1 %v1980_v27 }
 0x237   : > { %v1891_v9 = vadd.f32 %v1890_v38, %v1802_v20 }
 0x238   : > { %v2001_v31 = vpop.xlane.xlu1 %2000 }
 0x239   : > { %v1945_v14 = vmax.f32 %v1891_v9, 0.0  ;;  %v2069_v34 = vadd.f32 %v3960_v55, %v2001_v31 }
 0x23b   : > { %v1981_v50 = vmul.f32 %v3870_v2, %v1945_v14  ;;  %v2148_v18 = vperm.slane %v2069_v34, %v3964_v43 }
 0x23c   : > { %v1804_v39 = vpop.f32.mrf.mxu2 }
 0x23d   : > { %v1893_v56 = vpop.f32.mrf.mxu3  ;;  %v1805_v21 = vadd.f32 %v3862_v44, %v1804_v39  ;;  %2030 = vadd.xlane.f32.xlu2 %v1981_v50 }
 0x23f   : > { %v1894_v8 = vadd.f32 %v1893_v56, %v1805_v21 }
 0x240   : > { %v2003_v53 = vpop.xlane.xlu1 %2002 }
 0x241   : > { %v1946_v61 = vmax.f32 %v1894_v8, 0.0  ;;  %v2070_v40 = vadd.f32 %v3960_v55, %v2003_v53 }
 0x243   : > { %v2149_v17 = vperm.slane %v2070_v40, %v3969_v33  ;;  %v1982_v19 = vmul.f32 %v3870_v2, %v1946_v61 }
 0x244   : > { %v1806_v15 = vpop.f32.mrf.mxu2 }
 0x245   : > { %v1895_v5 = vpop.f32.mrf.mxu3  ;;  %v2150_v32 = vsel %vm2146_vm9, %v2149_v17, %v2148_v18  ;;  %v1807_v47 = vadd.f32 %v3862_v44, %v1806_v15  ;;  %2032 = vadd.xlane.f32.xlu0 %v1982_v19 }
 0x246   : > { %v3987_v24 = vsel %vm1288_vm2, %v2150_v32, %v2147_v63 }
 0x247   : > { %v1896_v4 = vadd.f32 %v1895_v5, %v1807_v47 }
 0x249   : > { %v1947_v28 = vmax.f32 %v1896_v4, 0.0 }
 0x24b   : > { %v1983_v30 = vmul.f32 %v3870_v2, %v1947_v28 }
 0x24c   : > { %v1809_v54 = vpop.f32.mrf.mxu2 }
 0x24d   : > { %v1898_v35 = vpop.f32.mrf.mxu3  ;;  %v1810_v52 = vadd.f32 %v3862_v44, %v1809_v54  ;;  %2034 = vadd.xlane.f32.xlu1 %v1983_v30 }
 0x24f   : > { %v1899_v62 = vadd.f32 %v1898_v35, %v1810_v52 }
 0x251   : > { %v1948_v58 = vmax.f32 %v1899_v62, 0.0 }
 0x253   : > { %v1984_v10 = vmul.f32 %v3870_v2, %v1948_v58 }
 0x254   : > { %v1811_v7 = vpop.f32.mrf.mxu2 }
 0x255   : > { %v1900_v11 = vpop.f32.mrf.mxu3  ;;  %v1812_v22 = vadd.f32 %v3862_v44, %v1811_v7  ;;  %2036 = vadd.xlane.f32.xlu2 %v1984_v10 }
 0x257   : > { %v1901_v45 = vadd.f32 %v1900_v11, %v1812_v22 }
 0x259   : > { %v1949_v13 = vmax.f32 %v1901_v45, 0.0 }
 0x25b   : > { %v1985_v12 = vmul.f32 %v3870_v2, %v1949_v13 }
 0x25c   : > { %v1814_v23 = vpop.f32.mrf.mxu2 }
 0x25d   : > { %v1903_v42 = vpop.f32.mrf.mxu3  ;;  %v1815_v6 = vadd.f32 %v3862_v44, %v1814_v23  ;;  %2038 = vadd.xlane.f32.xlu0 %v1985_v12 }
 0x25f   : > { %v1904_v60 = vadd.f32 %v1903_v42, %v1815_v6 }
 0x261   : > { %v1950_v48 = vmax.f32 %v1904_v60, 0.0  ;;  %v2101_v60 = vld [vmem:[%s466_s19] sm:$0xff] }
 0x263   : > { %v1986_v3 = vmul.f32 %v3870_v2, %v1950_v48  ;;  %v2102_v48 = vld [vmem:[%s466_s19 + $0x8] sm:$0xff] }
 0x264   : > { %v1816_v1 = vpop.f32.mrf.mxu2 }
 0x265   : > { %v1905_v16 = vpop.f32.mrf.mxu3  ;;  %v1817_v49 = vadd.f32 %v3862_v44, %v1816_v1  ;;  %2040 = vadd.xlane.f32.xlu1 %v1986_v3  ;;  %v2005_v3 = vpop.xlane.xlu2 %2004 }
 0x266   : > { %v2009_v1 = vpop.xlane.xlu0 %2008 }
 0x267   : > { %v1906_v29 = vadd.f32 %v1905_v16, %v1817_v49  ;;  %v2011_v49 = vpop.xlane.xlu1 %2010 }
 0x269   : > { %v1951_v59 = vmax.f32 %v1906_v29, 0.0 }
 0x26b   : > { %v1987_v0 = vmul.f32 %v3870_v2, %v1951_v59 }
 0x26c   : > { %v1819_v25 = vpop.f32.mrf.mxu2 }
 0x26d   : > { %v1908_v41 = vpop.f32.mrf.mxu3  ;;  %v1820_v46 = vadd.f32 %v3862_v44, %v1819_v25  ;;  %2042 = vadd.xlane.f32.xlu2 %v1987_v0  ;;  %v2007_v16 = vpop.xlane.xlu2 %2006 }
 0x26f   : > { %v1909_v37 = vadd.f32 %v1908_v41, %v1820_v46 }
 0x271   : > { %v1952_v57 = vmax.f32 %v1909_v37, 0.0 }
 0x273   : > { %v1988_v26 = vmul.f32 %v3870_v2, %v1952_v57 }
 0x274   : > { %v1821_v27 = vpop.f32.mrf.mxu2 }
 0x275   : > { %v1910_v36 = vpop.f32.mrf.mxu3  ;;  %v1822_v38 = vadd.f32 %v3862_v44, %v1821_v27  ;;  %2044 = vadd.xlane.f32.xlu0 %v1988_v26  ;;  %v2013_v29 = vpop.xlane.xlu2 %2012 }
 0x277   : > { %v1911_v63 = vadd.f32 %v1910_v36, %v1822_v38 }
 0x278   : > { %v2017_v59 = vpop.xlane.xlu1 %2016 }
 0x279   : > { %v1953_v20 = vmax.f32 %v1911_v63, 0.0 }
 0x27b   : > { %v1989_v9 = vmul.f32 %v3870_v2, %v1953_v20 }
 0x27c   : > { %v1824_v31 = vpop.f32.mrf.mxu2 }
 0x27d   : > { %v1913_v14 = vpop.f32.mrf.mxu3  ;;  %v1825_v50 = vadd.f32 %v3862_v44, %v1824_v31  ;;  %2046 = vadd.xlane.f32.xlu1 %v1989_v9  ;;  %v2072_v9 = vadd.f32 %v3960_v55, %v2007_v16 }
 0x27f   : > { %v1914_v39 = vadd.f32 %v1913_v14, %v1825_v50  ;;  %v2074_v14 = vadd.f32 %v3960_v55, %v2011_v49 }
 0x280   : > { %v2019_v25 = vpop.xlane.xlu2 %2018 }
 0x281   : > { %v1954_v56 = vmax.f32 %v1914_v39, 0.0 }
 0x283   : > { %v1990_v21 = vmul.f32 %v3870_v2, %v1954_v56  ;;  %v2071_v56 = vadd.f32 %v3960_v55, %v2005_v3 }
 0x284   : > { %v1826_v34 = vpop.f32.mrf.mxu2 }
 0x285   : > { %v1915_v8 = vpop.f32.mrf.mxu3  ;;  %v1827_v53 = vadd.f32 %v3862_v44, %v1826_v34  ;;  %2048 = vadd.xlane.f32.xlu2 %v1990_v21  ;;  %v2073_v34 = vadd.f32 %v3960_v55, %v2009_v1 }
 0x287   : > { %v1916_v61 = vadd.f32 %v1915_v8, %v1827_v53  ;;  %v2078_v8 = vadd.f32 %v3960_v55, %v2019_v25  ;;  %v2152_v53 = vperm.slane %v2072_v9, %v3969_v33 }
 0x289   : > { %v1955_v40 = vmax.f32 %v1916_v61, 0.0  ;;  %v2075_v61 = vadd.f32 %v3960_v55, %v2013_v29 }
 0x28b   : > { %v1991_v18 = vmul.f32 %v3870_v2, %v1955_v40 }
 0x28c   : > { %v1829_v17 = vpop.f32.mrf.mxu2 }
 0x28d   : > { %v1918_v19 = vpop.f32.mrf.mxu3  ;;  %v1830_v15 = vadd.f32 %v3862_v44, %v1829_v17  ;;  %2050 = vadd.xlane.f32.xlu0 %v1991_v18  ;;  %v2155_v18 = vperm.slane %v2074_v14, %v3969_v33  ;;  %v2077_v17 = vadd.f32 %v3960_v55, %v2017_v59 }
 0x28f   : > { %v1919_v5 = vadd.f32 %v1918_v19, %v1830_v15  ;;  %v2151_v15 = vperm.slane %v2071_v56, %v3964_v43 }
 0x290   : > { %v2023_v41 = vpop.xlane.xlu1 %2022 }
 0x291   : > { %v1956_v32 = vmax.f32 %v1919_v5, 0.0  ;;  %v2080_v40 = vadd.f32 %v3960_v55, %v2023_v41 }
 0x293   : > { %v1992_v47 = vmul.f32 %v3870_v2, %v1956_v32 }
 0x294   : > { %v1831_v4 = vpop.f32.mrf.mxu2 }
 0x295   : > { %v1920_v28 = vpop.f32.mrf.mxu3  ;;  %v1832_v30 = vadd.f32 %v3862_v44, %v1831_v4  ;;  %2052 = vadd.xlane.f32.xlu1 %v1992_v47  ;;  %v2154_v47 = vperm.slane %v2073_v34, %v3964_v43  ;;  %v2161_v4 = vperm.slane %v2078_v8, %v3969_v33 }
 0x297   : > { %v1921_v54 = vadd.f32 %v1920_v28, %v1832_v30  ;;  %v2153_v30 = vsel %vm2146_vm9, %v2152_v53, %v2151_v15 }
 0x298   : > { %v2025_v46 = vpop.xlane.xlu2 %2024 }
 0x299   : > { %v1957_v35 = vmax.f32 %v1921_v54, 0.0  ;;  %v2081_v28 = vadd.f32 %v3960_v55, %v2025_v46  ;;  %v2157_v54 = vperm.slane %v2075_v61, %v3964_v43 }
 0x29b   : > { %v1993_v52 = vmul.f32 %v3870_v2, %v1957_v35  ;;  %v2164_v35 = vperm.slane %v2080_v40, %v3969_v33 }
 0x29c   : > { %v1834_v62 = vpop.f32.mrf.mxu2 }
 0x29d   : > { %v1923_v58 = vpop.f32.mrf.mxu3  ;;  %v1835_v10 = vadd.f32 %v3862_v44, %v1834_v62  ;;  %2054 = vadd.xlane.f32.xlu2 %v1993_v52  ;;  %v2156_v62 = vsel %vm2146_vm9, %v2155_v18, %v2154_v47 }
 0x29f   : > { %v1924_v7 = vadd.f32 %v1923_v58, %v1835_v10  ;;  %v2160_v58 = vperm.slane %v2077_v17, %v3964_v43 }
 0x2a1   : > { %v1958_v11 = vmax.f32 %v1924_v7, 0.0 }
 0x2a3   : > { %v1994_v22 = vmul.f32 %v3870_v2, %v1958_v11 }
 0x2a4   : > { %v1836_v45 = vpop.f32.mrf.mxu2 }
 0x2a5   : > { %v1837_v13 = vadd.f32 %v3862_v44, %v1836_v45  ;;  %2056 = vadd.xlane.f32.xlu0 %v1994_v22  ;;  %v1925_v12 = vpop.f32.mrf.mxu3  ;;  %v2015_v44 = vpop.xlane.xlu0 %2014 }
 0x2a6   : > { %v2076_v21 = vadd.f32 %v3960_v55, %v2015_v44 }
 0x2a7   : > { %v1926_v23 = vadd.f32 %v1925_v12, %v1837_v13  ;;  %v2194_v13 = vsel %vm1291_vm3, %v2153_v30, %v3987_v24  ;;  %v2162_v12 = vsel %vm2146_vm9, %v2161_v4, %v2160_v58 }
 0x2a8   : > { %v2029_v37 = vpop.xlane.xlu1 %2028  ;;  %v2158_v5 = vperm.slane %v2076_v21, %v3969_v33 }
 0x2a9   : > { %v1959_v42 = vmax.f32 %v1926_v23, 0.0  ;;  %v2166_v23 = vperm.slane %v2081_v28, %v3964_v43  ;;  %v2083_v29 = vadd.f32 %v3960_v55, %v2029_v37 }
 0x2aa   : > { %v2159_v22 = vsel %vm2146_vm9, %v2158_v5, %v2157_v54 }
 0x2ab   : > { %v1995_v6 = vmul.f32 %v3870_v2, %v1959_v42  ;;  %v2195_v42 = vsel %vm1294_vm4, %v2156_v62, %v2194_v13 }
 0x2ac   : > { %v2196_v1 = vsel %vm1297_vm5, %v2159_v22, %v2195_v42 }
 0x2ad   : > { %2058 = vadd.xlane.f32.xlu1 %v1995_v6  ;;  %v2021_v0 = vpop.xlane.xlu0 %2020  ;;  %v2197_v16 = vsel %vm1300_vm6, %v2162_v12, %v2196_v1  ;;  %v4121_v1 = vshrl.u32 %v2099_v51, 7 }
 0x2ae   : > { %v2079_v32 = vadd.f32 %v3960_v55, %v2021_v0 }
 0x2af   : > { %3090 = vset.pattern.permute.xlu2 %v4121_v1 }
 0x2b0   : > { %v2031_v26 = vpop.xlane.xlu2 %2030  ;;  %v2163_v45 = vperm.slane %v2079_v32, %v3964_v43 }
 0x2b1   : > { %v2084_v6 = vadd.f32 %v3960_v55, %v2031_v26 }
 0x2b3   : > { %v2170_v59 = vperm.slane %v2084_v6, %v3969_v33 }
 0x2b5   : > { %v2027_v2 = vpop.xlane.xlu0 %2026 }
 0x2b6   : > { %v2082_v19 = vadd.f32 %v3960_v55, %v2027_v2 }
 0x2b8   : > { %v2167_v10 = vperm.slane %v2082_v19, %v3969_v33 }
 0x2b9   : > { %2104 = vperm.xlu0 %3088, %v2101_v60   ;;  %v2165_v60 = vsel %vm2146_vm9, %v2164_v35, %v2163_v45 }
 0x2ba   : > { %v2168_v3 = vsel %vm2146_vm9, %v2167_v10, %v2166_v23  ;;  %v2198_v44 = vsel %vm1303_vm7, %v2165_v60, %v2197_v16 }
 0x2bb   : > { %v2200_v41 = vsel %vm2199_vm10, %v2168_v3, %v2198_v44 }
 0x2bd   : > { %v2033_v57 = vpop.xlane.xlu0 %2032 }
 0x2c0   : > { %v2035_v27 = vpop.xlane.xlu1 %2034 }
 0x2c1   : > { %v2086_v24 = vadd.f32 %v3960_v55, %v2035_v27  ;;  %3092 = vset.pattern.permute.xlu0 %v4121_v1 }
 0x2c3   : > { %v2173_v27 = vperm.slane %v2086_v24, %v3969_v33 }
 0x2c6   : > { %2107 = vperm.xlu1 %3089, %v2102_v48   ;;  %v2085_v48 = vadd.f32 %v3960_v55, %v2033_v57 }
 0x2c8   : > { %v2037_v38 = vpop.xlane.xlu2 %2036  ;;  %v2172_v2 = vperm.slane %v2085_v48, %v3964_v43 }
 0x2c9   : > { %v2087_v46 = vadd.f32 %v3960_v55, %v2037_v38 }
 0x2ca   : > { %v2174_v61 = vsel %vm2146_vm9, %v2173_v27, %v2172_v2 }
 0x2cb   : > { %v2175_v8 = vperm.slane %v2087_v46, %v3964_v43 }
 0x2d0   : > { %v2039_v36 = vpop.xlane.xlu0 %2038 }
 0x2d1   : > { %v2088_v49 = vadd.f32 %v3960_v55, %v2039_v36 }
 0x2d3   : > { %v2176_v38 = vperm.slane %v2088_v49, %v3969_v33 }
 0x2d5   : > { %v2177_v19 = vsel %vm2146_vm9, %v2176_v38, %v2175_v8 }
 0x2d8   : > { %v2041_v63 = vpop.xlane.xlu1 %2040 }
 0x2d9   : > { %v2089_v36 = vadd.f32 %v3960_v55, %v2041_v63 }
 0x2db   : > { %v2178_v40 = vperm.slane %v2089_v36, %v3964_v43 }
 0x2e0   : > { %v2043_v31 = vpop.xlane.xlu2 %2042 }
 0x2e1   : > { %v2090_v0 = vadd.f32 %v3960_v55, %v2043_v31 }
 0x2e3   : > { %v2179_v56 = vperm.slane %v2090_v0, %v3969_v33 }
 0x2e5   : > { %v2180_v47 = vsel %vm2146_vm9, %v2179_v56, %v2178_v40  ;;  %v4382_v40 = vld [vmem:[#allocation3_spill] sm:$0xff] }
 0x2e8   : > { %v4018_v20 = vpop.xlane.xlu0 %2044 }
 0x2e9   : > { %v2091_v31 = vadd.f32 %v3960_v55, %v4018_v20 }
 0x2eb   : > { %v2181_v15 = vperm.slane %v2091_v31, %v3964_v43 }
 0x2f0   : > { %v2047_v50 = vpop.xlane.xlu1 %2046 }
 0x2f1   : > { %v2092_v57 = vadd.f32 %v3960_v55, %v2047_v50 }
 0x2f3   : > { %v2182_v53 = vperm.slane %v2092_v57, %v3969_v33 }
 0x2f5   : > { %v2183_v54 = vsel %vm2146_vm9, %v2182_v53, %v2181_v15 }
 0x2f8   : > { %v2049_v52 = vpop.xlane.xlu2 %2048 }
 0x2f9   : > { %v2093_v21 = vadd.f32 %v3960_v55, %v2049_v52 }
 0x2fb   : > { %v2184_v4 = vperm.slane %v2093_v21, %v3964_v43 }
 0x300   : > { %v2051_v39 = vpop.xlane.xlu0 %2050 }
 0x301   : > { %v2094_v9 = vadd.f32 %v3960_v55, %v2051_v39  ;;  %v2169_v39 = vperm.slane %v2083_v29, %v3964_v43 }
 0x303   : > { %v2185_v18 = vperm.slane %v2094_v9, %v3969_v33  ;;  %v2171_v32 = vsel %vm2146_vm9, %v2170_v59, %v2169_v39  ;;  %v4380_v39 = vld [vmem:[#allocation4_spill] sm:$0xff] }
 0x304   : > { %v2201_v30 = vsel %vm1288_vm2, %v2174_v61, %v2171_v32  ;;  %v4381_v8 = vunpack.c.l.bf16 %v4380_v39 }
 0x305   : > { %v2202_v35 = vsel %vm1291_vm3, %v2177_v19, %v2201_v30  ;;  %v2186_v52 = vsel %vm2146_vm9, %v2185_v18, %v2184_v4  ;;  %v4383_v18 = vunpack.c.h.bf16 %v4382_v40  ;;  %v4384_v19 = vunpack.c.h.bf16 %v4380_v39  ;;  %v4388_v30 = vld [vmem:[#allocation6_spill] sm:$0xff] }
 0x306   : > { %v2203_v58 = vsel %vm1294_vm4, %v2180_v47, %v2202_v35  ;;  %v4387_v4 = vunpack.c.l.bf16 %v4382_v40 }
 0x308   : > { %v2053_v7 = vpop.xlane.xlu1 %2052 }
 0x309   : > { %v2095_v20 = vadd.f32 %v3960_v55, %v2053_v7 }
 0x310   : > { %v2055_v25 = vpop.xlane.xlu2 %2054 }
 0x311   : > { %v2096_v14 = vadd.f32 %v3960_v55, %v2055_v25 }
 0x313   : > { %v2188_v5 = vperm.slane %v2096_v14, %v3969_v33 }
 0x318   : > { %v2057_v11 = vpop.xlane.xlu0 %2056 }
 0x319   : > { %v2097_v17 = vadd.f32 %v3960_v55, %v2057_v11 }
 0x31b   : > { %v2190_v62 = vperm.slane %v2097_v17, %v3964_v43 }
 0x320   : > { %v2059_v26 = vpop.xlane.xlu1 %2058 }
 0x321   : > { %v2098_v34 = vadd.f32 %v3960_v55, %v2059_v26  ;;  %v2187_v55 = vperm.slane %v2095_v20, %v3964_v43 }
 0x323   : > { %v2191_v28 = vperm.slane %v2098_v34, %v3969_v33  ;;  %v2189_v10 = vsel %vm2146_vm9, %v2188_v5, %v2187_v55  ;;  %v2204_v33 = vsel %vm1297_vm5, %v2183_v54, %v2203_v58  ;;  %v4385_v5 = vld [vmem:[#allocation5_spill] sm:$0xff]  ;;  %v4389_v54 = vunpack.c.l.bf16 %v4388_v30  ;;  %v4391_v58 = vld [vmem:[#allocation7_spill] sm:$0xff] }
 0x324   : > { %v2205_v11 = vsel %vm1300_vm6, %v2186_v52, %v2204_v33  ;;  %v4386_v32 = vunpack.c.l.bf16 %v4385_v5  ;;  %v4390_v52 = vunpack.c.h.bf16 %v4385_v5 }
 0x325   : > { %v2192_v7 = vsel %vm2146_vm9, %v2191_v28, %v2190_v62  ;;  %v2206_v45 = vsel %vm1303_vm7, %v2189_v10, %v2205_v11  ;;  %v4392_v10 = vunpack.c.l.bf16 %v4391_v58  ;;  %v4393_v11 = vunpack.c.h.bf16 %v4388_v30 }
 0x326   : > { %v2207_v13 = vsel %vm2199_vm10, %v2192_v7, %v2206_v45 }
 0x32b   : > { %v2105_v37 = vpop.permute.xlu0 %2104 }
 0x32c   : > { %vm2109_vm12 = vcmp.lt.s32.totalorder %v3964_v43, %v2105_v37 }
 0x32d   : > { %v2210_v50 = vsel %vm2109_vm12, %v2200_v41, -1024.0 }
 0x32e   : > { %2213 = vst.msk [vmem:[%s4071_s25] sm:$0xff] %vm2212_vm11, %v2210_v50  ;;  %v2215_v63 = vsel %vm2212_vm11, %v2210_v50, -inf }
 0x32f   : > { %2216 = vmax.xlane.f32.xlu2 %v2215_v63 }
 0x338   : > { %v2108_v22 = vpop.permute.xlu1 %2107 }
 0x339   : > { %vm2110_vm13 = vcmp.lt.s32.totalorder %v3964_v43, %v2108_v22  ;;  %v4125_v43 = vadd.s32 8, %v4121_v1 }
 0x33a   : > { %v2211_v12 = vsel %vm2110_vm13, %v2207_v13, -1024.0 }
 0x33b   : > { %2214 = vst.msk [vmem:[%s4071_s25 + $0x8] sm:$0xff] %vm2212_vm11, %v2211_v12  ;;  %v2218_v23 = vsel %vm2212_vm11, %v2211_v12, -inf  ;;  %3091 = vset.pattern.permute.xlu1 %v4125_v43 }
 0x33c   : > { %2219 = vmax.xlane.f32.xlu1 %v2218_v23 }
 0x3a2   : > { %v2217_v42 = vpop.xlane.xlu2 %2216 }
 0x3a3   : > { %v2221_v6 = vsub.f32 %v2210_v50, %v2217_v42 }
 0x3a5   : > { %v2223_v60 = vmul.f32 1.442695, %v2221_v6 }
 0x3a7   : > { %3112 = vpow2.f32 %v2223_v60 }
 0x3ad   : > { %v3113_v48 = vpop.eup %3112 }
 0x3ae   : > { %v2227_v3 = vsel %vm2212_vm11, %v3113_v48, 0.0 }
 0x3af   : > { %2228 = vadd.xlane.f32.xlu0 %v2227_v3  ;;  %v2220_v46 = vpop.xlane.xlu1 %2219 }
 0x3b0   : > { %v2222_v57 = vsub.f32 %v2211_v12, %v2220_v46  ;;  %v4394_v12 = vunpack.c.h.bf16 %v4391_v58  ;;  %v4398_v46 = vld [vmem:[#allocation9_spill] sm:$0xff] }
 0x3b2   : > { %v2225_v26 = vmul.f32 1.442695, %v2222_v57  ;;  %v4399_v57 = vunpack.c.l.bf16 %v4398_v46 }
 0x422   : > { %v2229_v24 = vpop.xlane.xlu0 %2228 }
 0x423   : > { %3114 = vrcp.f32 %v2229_v24 }
 0x424   : > { %3116 = vpow2.f32 %v2225_v26 }
 0x429   : > { %v3115_v16 = vpop.eup %3114 }
 0x42a   : > { %v2235_v49 = vmul.f32 %v3115_v16, %v3113_v48  ;;  %v4137_v27 = vpop.eup %3116  ;;  %v4395_v48 = vld [vmem:[#allocation8_spill] sm:$0xff] }
 0x42b   : > { %v2230_v36 = vsel %vm2212_vm11, %v4137_v27, 0.0  ;;  %v4396_v3 = vunpack.c.h.bf16 %v4395_v48 }
 0x42c   : > { %v2250_v44 = vperm.slane %v2235_v49, 1  ;;  %v2237_v29 = vperm.slane %v2235_v49, 0  ;;  %v2315_v51 = vperm.slane %v2235_v49, 6  ;;  %v2263_v59 = vperm.slane %v2235_v49, 2 }
 0x42d   : > { %v2328_v0 = vperm.slane %v2235_v49, 7  ;;  %v2276_v25 = vperm.slane %v2235_v49, 3  ;;  %v2289_v41 = vperm.slane %v2235_v49, 4  ;;  %v2302_v2 = vperm.slane %v2235_v49, 5 }
 0x42e   : > { %2255 = vperm.xlu0 %3092, %v2250_v44   ;;  %2248 = vperm.xlu1 %3091, %v2237_v29  }
 0x42f   : > { %2242 = vperm.xlu2 %3090, %v2237_v29  }
 0x436   : > { %2320 = vperm.xlu0 %3092, %v2315_v51   ;;  %3094 = vset.pattern.permute.xlu1 %v4121_v1 }
 0x437   : > { %3093 = vset.pattern.permute.xlu2 %v4125_v43 }
 0x43e   : > { %3097 = vset.pattern.permute.xlu0 %v4125_v43  ;;  %2268 = vperm.xlu1 %3094, %v2263_v59  }
 0x43f   : > { %2261 = vperm.xlu2 %3093, %v2250_v44  }
 0x446   : > { %2339 = vperm.xlu0 %3097, %v2328_v0   ;;  %2281 = vperm.xlu1 %3094, %v2276_v25  }
 0x447   : > { %2274 = vperm.xlu2 %3093, %v2263_v59   ;;  %v4397_v59 = vunpack.c.l.bf16 %v4395_v48 }
 0x44e   : > { %2294 = vperm.xlu1 %3094, %v2289_v41   ;;  %3100 = vset.pattern.permute.xlu0 %v4121_v1 }
 0x44f   : > { %2287 = vperm.xlu2 %3093, %v2276_v25  }
 0x456   : > { %2307 = vperm.xlu1 %3094, %v2302_v2  }
 0x457   : > { %2300 = vperm.xlu2 %3093, %v2289_v41  }
 0x45e   : > { %3095 = vset.pattern.permute.xlu1 %v4125_v43 }
 0x45f   : > { %2313 = vperm.xlu2 %3093, %v2302_v2  }
 0x466   : > { %2326 = vperm.xlu1 %3095, %v2315_v51  }
 0x467   : > { %3096 = vset.pattern.permute.xlu2 %v4121_v1 }
 0x46e   : > { %3098 = vset.pattern.permute.xlu1 %v4121_v1 }
 0x46f   : > { %2333 = vperm.xlu2 %3096, %v2328_v0  }
 0x477   : > { %3099 = vset.pattern.permute.xlu2 %v4125_v43 }
 0x489   : > { %v2243_v37 = vpop.permute.xlu2 %2242 }
 0x48a   : > { %v2445_v28 = vmul.f32 %v2243_v37, %v4387_v4 }
 0x48c   : > { %v2477_v42 = vsel %vm668_vm0, %v2445_v28, 0.0 }
 0x498   : > { %2231 = vadd.xlane.f32.xlu2 %v2230_v36 }
 0x499   : > { %v2262_v9 = vpop.permute.xlu2 %2261 }
 0x49a   : > { %v2448_v15 = vmul.f32 %v2262_v9, %v4384_v19 }
 0x49c   : > { %v2487_v45 = vsel %vm668_vm0, %v2448_v15, 0.0 }
 0x4a0   : > { %v2249_v31 = vpop.permute.xlu1 %2248  ;;  %v2256_v56 = vpop.permute.xlu0 %2255 }
 0x4a1   : > { %v2275_v38 = vpop.permute.xlu2 %2274  ;;  %v2447_v53 = vmul.f32 %v2256_v56, %v4381_v8  ;;  %v2446_v17 = vmul.f32 %v2249_v31, %v4383_v18  ;;  %v4400_v31 = vunpack.c.h.bf16 %v4398_v46 }
 0x4a2   : > { %v2450_v62 = vmul.f32 %v2275_v38, %v4390_v52 }
 0x4a3   : > { %v2486_v35 = vsel %vm668_vm0, %v2447_v53, 0.0  ;;  %v2478_v33 = vsel %vm668_vm0, %v2446_v17, 0.0 }
 0x4a4   : > { %v2488_v6 = vadd.f32 %v2487_v45, %v2486_v35  ;;  %v2479_v49 = vadd.f32 %v2478_v33, %v2477_v42  ;;  %v2496_v44 = vsel %vm668_vm0, %v2450_v62, 0.0 }
 0x4a6   : > { %v2489_v38 = vrot.slane %v2488_v6, 4 }
 0x4a8   : > { %v2321_v20 = vpop.permute.xlu0 %2320  ;;  %v2490_v53 = vadd.f32 %v2489_v38, %v2488_v6 }
 0x4a9   : > { %v2288_v14 = vpop.permute.xlu2 %2287 }
 0x4aa   : > { %v2452_v22 = vmul.f32 %v2288_v14, %v4393_v11 }
 0x4ac   : > { %v2505_v41 = vsel %vm668_vm0, %v2452_v22, 0.0 }
 0x4b0   : > { %v2269_v50 = vpop.permute.xlu1 %2268 }
 0x4b1   : > { %v2301_v21 = vpop.permute.xlu2 %2300  ;;  %v2449_v47 = vmul.f32 %v2269_v50, %v4386_v32  ;;  %v2491_v32 = vrot.slane %v2490_v53, 2 }
 0x4b2   : > { %v2454_v23 = vmul.f32 %v2301_v21, %v4394_v12  ;;  %v2480_v21 = vrot.slane %v2479_v49, 4 }
 0x4b3   : > { %v2495_v13 = vsel %vm668_vm0, %v2449_v47, 0.0  ;;  %v2492_v58 = vadd.f32 %v2491_v32, %v2490_v53 }
 0x4b4   : > { %v2497_v2 = vadd.f32 %v2496_v44, %v2495_v13  ;;  %v2514_v37 = vsel %vm668_vm0, %v2454_v23, 0.0  ;;  %v2481_v18 = vadd.f32 %v2480_v21, %v2479_v49 }
 0x4b6   : > { %v2482_v4 = vrot.slane %v2481_v18, 2 }
 0x4b8   : > { %v2282_v34 = vpop.permute.xlu1 %2281  ;;  %v2340_v29 = vpop.permute.xlu0 %2339  ;;  %v2483_v33 = vadd.f32 %v2482_v4, %v2481_v18 }
 0x4b9   : > { %v2314_v61 = vpop.permute.xlu2 %2313  ;;  %v2451_v55 = vmul.f32 %v2282_v34, %v4389_v54  ;;  %v2460_v14 = vmul.f32 %v2340_v29, %v4400_v31 }
 0x4ba   : > { %v2456_v24 = vmul.f32 %v2314_v61, %v4396_v3  ;;  %v2493_v3 = vrot.slane %v2492_v58, 1 }
 0x4bb   : > { %v2504_v60 = vsel %vm668_vm0, %v2451_v55, 0.0  ;;  %v2541_v61 = vsel %vm668_vm0, %v2460_v14, 0.0  ;;  %v4401_v55 = vld [vmem:[#allocation10_spill] sm:$0xff] }
 0x4bc   : > { %v2506_v36 = vadd.f32 %v2505_v41, %v2504_v60  ;;  %v2523_v50 = vsel %vm668_vm0, %v2456_v24, 0.0  ;;  %v4402_v35 = vunpack.c.l.bf16 %v4401_v55  ;;  %v4403_v45 = vunpack.c.h.bf16 %v4401_v55 }
 0x4be   : > { %v2507_v8 = vrot.slane %v2506_v36, 4  ;;  %v2457_v52 = vmul.f32 %v2321_v20, %v4402_v35  ;;  %v2484_v20 = vrot.slane %v2483_v33, 1 }
 0x4c0   : > { %v2295_v63 = vpop.permute.xlu1 %2294  ;;  %v2508_v5 = vadd.f32 %v2507_v8, %v2506_v36  ;;  %v2531_v23 = vsel %vm668_vm0, %v2457_v52, 0.0 }
 0x4c1   : > { %v2453_v7 = vmul.f32 %v2295_v63, %v4392_v10  ;;  %v2498_v63 = vrot.slane %v2497_v2, 4 }
 0x4c2   : > { %v2509_v62 = vrot.slane %v2508_v5, 2 }
 0x4c3   : > { %v2513_v51 = vsel %vm668_vm0, %v2453_v7, 0.0  ;;  %v2499_v15 = vadd.f32 %v2498_v63, %v2497_v2 }
 0x4c4   : > { %v2515_v56 = vadd.f32 %v2514_v37, %v2513_v51  ;;  %v2510_v42 = vadd.f32 %v2509_v62, %v2508_v5 }
 0x4c5   : > { %v2500_v54 = vrot.slane %v2499_v15, 2 }
 0x4c6   : > { %v2516_v40 = vrot.slane %v2515_v56, 4  ;;  %v2511_v29 = vrot.slane %v2510_v42, 1 }
 0x4c7   : > { %v2501_v12 = vadd.f32 %v2500_v54, %v2499_v15 }
 0x4c8   : > { %v2308_v16 = vpop.permute.xlu1 %2307  ;;  %v2517_v47 = vadd.f32 %v2516_v40, %v2515_v56 }
 0x4c9   : > { %v2455_v0 = vmul.f32 %v2308_v16, %v4397_v59  ;;  %v2334_v25 = vpop.permute.xlu2 %2333  ;;  %v2502_v49 = vrot.slane %v2501_v12, 1 }
 0x4ca   : > { %v2459_v26 = vmul.f32 %v2334_v25, %v4399_v57  ;;  %v2518_v10 = vrot.slane %v2517_v47, 2  ;;  %v2485_v25 = vadd.f32 %v2484_v20, %v2483_v33 }
 0x4cb   : > { %v2522_v9 = vsel %vm668_vm0, %v2455_v0, 0.0  ;;  %v2494_v0 = vadd.f32 %v2493_v3, %v2492_v58  ;;  %v2503_v46 = vadd.f32 %v2502_v49, %v2501_v12  ;;  %v4408_v12 = vld [vmem:[#allocation13_spill] sm:$0xff] }
 0x4cc   : > { %v2524_v34 = vadd.f32 %v2523_v50, %v2522_v9  ;;  %v2540_v39 = vsel %vm668_vm0, %v2459_v26, 0.0  ;;  %v2519_v60 = vadd.f32 %v2518_v10, %v2517_v47  ;;  %v2512_v26 = vadd.f32 %v2511_v29, %v2510_v42 }
 0x4cd   : > { %v2542_v19 = vadd.f32 %v2541_v61, %v2540_v39  ;;  %v2637_v9 = vsel %vm1288_vm2, %v2494_v0, %v2485_v25  ;;  %v4414_v49 = vunpack.c.l.bf16 %v4408_v12 }
 0x4ce   : > { %v2525_v17 = vrot.slane %v2524_v34, 4  ;;  %v2520_v51 = vrot.slane %v2519_v60, 1  ;;  %v2638_v14 = vsel %vm1291_vm3, %v2503_v46, %v2637_v9 }
 0x4cf   : > { %v2543_v30 = vrot.slane %v2542_v19, 4  ;;  %v2639_v56 = vsel %vm1294_vm4, %v2512_v26, %v2638_v14  ;;  %v4416_v26 = vld [vmem:[#allocation22_spill] sm:$0xff]  ;;  %v4418_v14 = vld [vmem:[#allocation21_spill] sm:$0xff] }
 0x4d0   : > { %v2526_v28 = vadd.f32 %v2525_v17, %v2524_v34  ;;  %v2521_v37 = vadd.f32 %v2520_v51, %v2519_v60 }
 0x4d1   : > { %v2544_v22 = vadd.f32 %v2543_v30, %v2542_v19 }
 0x4d2   : > { %v2527_v11 = vrot.slane %v2526_v28, 2  ;;  %v2640_v21 = vsel %vm1297_vm5, %v2521_v37, %v2639_v56  ;;  %v4417_v37 = vunpack.c.l.bf16 %v4416_v26 }
 0x4d3   : > { %v2545_v16 = vrot.slane %v2544_v22, 2 }
 0x4d4   : > { %v2528_v24 = vadd.f32 %v2527_v11, %v2526_v28 }
 0x4d5   : > { %v2546_v2 = vadd.f32 %v2545_v16, %v2544_v22  ;;  %v4406_v22 = vld [vmem:[#allocation11_spill] sm:$0xff] }
 0x4d6   : > { %v2529_v41 = vrot.slane %v2528_v24, 1 }
 0x4d7   : > { %v2547_v31 = vrot.slane %v2546_v2, 1 }
 0x4d8   : > { %v2327_v7 = vpop.permute.xlu1 %2326  ;;  %v2530_v38 = vadd.f32 %v2529_v41, %v2528_v24  ;;  %v4413_v24 = vunpack.c.h.bf16 %v4406_v22 }
 0x4d9   : > { %v2458_v13 = vmul.f32 %v2327_v7, %v4403_v45  ;;  %v2548_v39 = vadd.f32 %v2547_v31, %v2546_v2  ;;  %v4407_v45 = vunpack.c.l.bf16 %v4406_v22 }
 0x4da   : > { %v2641_v63 = vsel %vm1300_vm6, %v2530_v38, %v2640_v21 }
 0x4db   : > { %v2532_v6 = vsel %vm668_vm0, %v2458_v13, 0.0 }
 0x4dc   : > { %v2533_v48 = vadd.f32 %v2532_v6, %v2531_v23  ;;  %v4409_v23 = vunpack.c.h.bf16 %v4408_v12 }
 0x4de   : > { %v2534_v44 = vrot.slane %v2533_v48, 4 }
 0x4e0   : > { %v2535_v59 = vadd.f32 %v2534_v44, %v2533_v48  ;;  %v4411_v48 = vld [vmem:[#allocation20_spill] sm:$0xff] }
 0x4e1   : > { %v4412_v3 = vunpack.c.h.bf16 %v4411_v48  ;;  %v4415_v29 = vunpack.c.l.bf16 %v4411_v48 }
 0x4e2   : > { %v2536_v57 = vrot.slane %v2535_v59, 2 }
 0x4e4   : > { %v2537_v36 = vadd.f32 %v2536_v57, %v2535_v59 }
 0x4e6   : > { %v2538_v50 = vrot.slane %v2537_v36, 1 }
 0x4e8   : > { %v2539_v34 = vadd.f32 %v2538_v50, %v2537_v36  ;;  %v4419_v50 = vunpack.c.h.bf16 %v4418_v14 }
 0x4ea   : > { %v2642_v8 = vsel %vm1303_vm7, %v2539_v34, %v2641_v63  ;;  %v4420_v63 = vunpack.c.h.bf16 %v4416_v26 }
 0x4eb   : > { %v2643_v53 = vsel %vm2199_vm10, %v2548_v39, %v2642_v8 }
 0x4ec   : > { %2653 = vst.msk [vmem:[%s4198_s29] sm:$0xff] %vm668_vm0, %v2643_v53  ;;  %v4421_v53 = vunpack.c.l.bf16 %v4418_v14 }
 0x50b   : > { %v2232_v61 = vpop.xlane.xlu2 %2231 }
 0x50c   : > { %3118 = vrcp.f32 %v2232_v61 }
 0x512   : > { %v3119_v40 = vpop.eup %3118 }
 0x513   : > { %v2236_v18 = vmul.f32 %v3119_v40, %v4137_v27  ;;  %v4422_v40 = vld [vmem:[#allocation23_spill] sm:$0xff] }
 0x515   : > { %v2367_v17 = vperm.slane %v2236_v18, 2  ;;  %v2341_v19 = vperm.slane %v2236_v18, 0  ;;  %v2354_v15 = vperm.slane %v2236_v18, 1  ;;  %v2393_v5 = vperm.slane %v2236_v18, 4 }
 0x516   : > { %v2380_v32 = vperm.slane %v2236_v18, 3  ;;  %v2432_v27 = vperm.slane %v2236_v18, 7  ;;  %v2406_v47 = vperm.slane %v2236_v18, 5  ;;  %v2419_v4 = vperm.slane %v2236_v18, 6 }
 0x517   : > { %2372 = vperm.xlu0 %3100, %v2367_v17   ;;  %2352 = vperm.xlu2 %3099, %v2341_v19   ;;  %v4423_v18 = vunpack.c.h.bf16 %v4422_v40 }
 0x518   : > { %2346 = vperm.xlu1 %3098, %v2341_v19  }
 0x51f   : > { %3103 = vset.pattern.permute.xlu0 %v4125_v43  ;;  %2365 = vperm.xlu2 %3099, %v2354_v15  }
 0x520   : > { %2359 = vperm.xlu1 %3098, %v2354_v15  }
 0x527   : > { %2404 = vperm.xlu0 %3103, %v2393_v5   ;;  %3102 = vset.pattern.permute.xlu2 %v4121_v1 }
 0x528   : > { %3101 = vset.pattern.permute.xlu1 %v4125_v43 }
 0x52f   : > { %3106 = vset.pattern.permute.xlu0 %v4121_v1  ;;  %2385 = vperm.xlu2 %3102, %v2380_v32  }
 0x530   : > { %2378 = vperm.xlu1 %3101, %v2367_v17  }
 0x537   : > { %2437 = vperm.xlu0 %3106, %v2432_v27   ;;  %2398 = vperm.xlu2 %3102, %v2393_v5  }
 0x538   : > { %2391 = vperm.xlu1 %3101, %v2380_v32   ;;  %v4424_v32 = vunpack.c.l.bf16 %v4422_v40 }
 0x53f   : > { %3105 = vset.pattern.permute.xlu2 %v4125_v43  ;;  %3108 = vset.pattern.permute.xlu0 %v4125_v43 }
 0x540   : > { %3104 = vset.pattern.permute.xlu1 %v4121_v1  ;;  %v4404_v1 = vld [vmem:[#allocation12_spill] sm:$0xff] }
 0x541   : > { %v4405_v33 = vunpack.c.l.bf16 %v4404_v1  ;;  %v4410_v6 = vunpack.c.h.bf16 %v4404_v1 }
 0x547   : > { %2417 = vperm.xlu2 %3105, %v2406_v47  }
 0x548   : > { %2411 = vperm.xlu1 %3104, %v2406_v47  }
 0x54f   : > { %2430 = vperm.xlu2 %3105, %v2419_v4  }
 0x550   : > { %2424 = vperm.xlu1 %3104, %v2419_v4  }
 0x558   : > { %3107 = vset.pattern.permute.xlu1 %v4125_v43 }
 0x560   : > { %2443 = vperm.xlu1 %3107, %v2432_v27  }
 0x571   : > { %v2353_v28 = vpop.permute.xlu2 %2352 }
 0x572   : > { %v2462_v16 = vmul.f32 %v2353_v28, %v4413_v24 }
 0x574   : > { %v2550_v9 = vsel %vm668_vm0, %v2462_v16, 0.0 }
 0x579   : > { %v2366_v54 = vpop.permute.xlu2 %2365 }
 0x57a   : > { %v2464_v60 = vmul.f32 %v2366_v54, %v4410_v6 }
 0x57c   : > { %v2559_v2 = vsel %vm668_vm0, %v2464_v60, 0.0 }
 0x589   : > { %v2386_v35 = vpop.permute.xlu2 %2385  ;;  %v2373_v10 = vpop.permute.xlu0 %2372 }
 0x58a   : > { %v2347_v30 = vpop.permute.xlu1 %2346  ;;  %v2465_v44 = vmul.f32 %v2373_v10, %v4414_v49  ;;  %v2467_v51 = vmul.f32 %v2386_v35, %v4415_v29  ;;  %v4425_v49 = vld [vmem:[#allocation24_spill] sm:$0xff] }
 0x58b   : > { %v2461_v13 = vmul.f32 %v2347_v30, %v4407_v45 }
 0x58c   : > { %v2567_v38 = vsel %vm668_vm0, %v2465_v44, 0.0  ;;  %v2576_v21 = vsel %vm668_vm0, %v2467_v51, 0.0  ;;  %v4426_v44 = vunpack.c.l.bf16 %v4425_v49 }
 0x58d   : > { %v2549_v25 = vsel %vm668_vm0, %v2461_v13, 0.0 }
 0x58e   : > { %v2551_v34 = vadd.f32 %v2550_v9, %v2549_v25 }
 0x590   : > { %v2552_v28 = vrot.slane %v2551_v34, 4 }
 0x591   : > { %v2399_v62 = vpop.permute.xlu2 %2398 }
 0x592   : > { %v2360_v55 = vpop.permute.xlu1 %2359  ;;  %v2469_v61 = vmul.f32 %v2399_v62, %v4421_v53 }
 0x593   : > { %v2463_v11 = vmul.f32 %v2360_v55, %v4405_v33 }
 0x594   : > { %v2585_v35 = vsel %vm668_vm0, %v2469_v61, 0.0 }
 0x595   : > { %v2558_v59 = vsel %vm668_vm0, %v2463_v11, 0.0  ;;  %v2553_v11 = vadd.f32 %v2552_v28, %v2551_v34 }
 0x596   : > { %v2560_v31 = vadd.f32 %v2559_v2, %v2558_v59 }
 0x598   : > { %v2561_v47 = vrot.slane %v2560_v31, 4 }
 0x599   : > { %v2405_v0 = vpop.permute.xlu0 %2404 }
 0x59a   : > { %v2470_v56 = vmul.f32 %v2405_v0, %v4419_v50  ;;  %v2562_v1 = vadd.f32 %v2561_v47, %v2560_v31 }
 0x59c   : > { %v2586_v4 = vsel %vm668_vm0, %v2470_v56, 0.0 }
 0x59d   : > { %v2587_v10 = vadd.f32 %v2586_v4, %v2585_v35 }
 0x59f   : > { %v2588_v13 = vrot.slane %v2587_v10, 4 }
 0x5a1   : > { %v2418_v7 = vpop.permute.xlu2 %2417 }
 0x5a2   : > { %v2379_v52 = vpop.permute.xlu1 %2378  ;;  %v2472_v39 = vmul.f32 %v2418_v7, %v4420_v63 }
 0x5a3   : > { %v2466_v43 = vmul.f32 %v2379_v52, %v4409_v23  ;;  %v2563_v23 = vrot.slane %v2562_v1, 2 }
 0x5a4   : > { %v2595_v30 = vsel %vm668_vm0, %v2472_v39, 0.0 }
 0x5a5   : > { %v2568_v41 = vsel %vm668_vm0, %v2466_v43, 0.0  ;;  %v2564_v24 = vadd.f32 %v2563_v23, %v2562_v1 }
 0x5a6   : > { %v2569_v8 = vadd.f32 %v2568_v41, %v2567_v38 }
 0x5a7   : > { %v2565_v26 = vrot.slane %v2564_v24, 1 }
 0x5a8   : > { %v2570_v54 = vrot.slane %v2569_v8, 4 }
 0x5a9   : > { %v2431_v46 = vpop.permute.xlu2 %2430  ;;  %v2438_v6 = vpop.permute.xlu0 %2437  ;;  %v2566_v34 = vadd.f32 %v2565_v26, %v2564_v24 }
 0x5aa   : > { %v2392_v58 = vpop.permute.xlu1 %2391  ;;  %v2474_v17 = vmul.f32 %v2431_v46, %v4423_v18  ;;  %v2571_v33 = vadd.f32 %v2570_v54, %v2569_v8  ;;  %v2475_v29 = vmul.f32 %v2438_v6, %v4426_v44  ;;  %v4427_v46 = vunpack.c.h.bf16 %v4425_v49 }
 0x5ab   : > { %v2468_v20 = vmul.f32 %v2392_v58, %v4412_v3  ;;  %v2589_v3 = vadd.f32 %v2588_v13, %v2587_v10 }
 0x5ac   : > { %v2604_v52 = vsel %vm668_vm0, %v2474_v17, 0.0  ;;  %v2572_v43 = vrot.slane %v2571_v33, 2 }
 0x5ad   : > { %v2577_v57 = vsel %vm668_vm0, %v2468_v20, 0.0  ;;  %v2590_v41 = vrot.slane %v2589_v3, 2 }
 0x5ae   : > { %v2578_v19 = vadd.f32 %v2577_v57, %v2576_v21  ;;  %v2573_v16 = vadd.f32 %v2572_v43, %v2571_v33 }
 0x5af   : > { %v2591_v56 = vadd.f32 %v2590_v41, %v2589_v3 }
 0x5b0   : > { %v2579_v62 = vrot.slane %v2578_v19, 4 }
 0x5b1   : > { %v2592_v18 = vrot.slane %v2591_v56, 1 }
 0x5b2   : > { %v2580_v22 = vadd.f32 %v2579_v62, %v2578_v19 }
 0x5b3   : > { %v2593_v4 = vadd.f32 %v2592_v18, %v2591_v56 }
 0x5b4   : > { %v2581_v60 = vrot.slane %v2580_v22, 2 }
 0x5b6   : > { %v2582_v59 = vadd.f32 %v2581_v60, %v2580_v22 }
 0x5b8   : > { %v2583_v31 = vrot.slane %v2582_v59, 1 }
 0x5ba   : > { %v2412_v42 = vpop.permute.xlu1 %2411  ;;  %v2584_v53 = vadd.f32 %v2583_v31, %v2582_v59 }
 0x5bb   : > { %v2471_v36 = vmul.f32 %v2412_v42, %v4417_v37  ;;  %v2554_v42 = vrot.slane %v2553_v11, 2  ;;  %v2574_v37 = vrot.slane %v2573_v16, 1 }
 0x5bd   : > { %v2594_v5 = vsel %vm668_vm0, %v2471_v36, 0.0  ;;  %v2555_v51 = vadd.f32 %v2554_v42, %v2553_v11  ;;  %v2612_v36 = vsel %vm668_vm0, %v2475_v29, 0.0  ;;  %v2575_v39 = vadd.f32 %v2574_v37, %v2573_v16 }
 0x5be   : > { %v2596_v58 = vadd.f32 %v2595_v30, %v2594_v5 }
 0x5bf   : > { %v2556_v38 = vrot.slane %v2555_v51, 1 }
 0x5c0   : > { %v2597_v45 = vrot.slane %v2596_v58, 4 }
 0x5c1   : > { %v2557_v8 = vadd.f32 %v2556_v38, %v2555_v51 }
 0x5c2   : > { %v2425_v15 = vpop.permute.xlu1 %2424  ;;  %v2598_v48 = vadd.f32 %v2597_v45, %v2596_v58 }
 0x5c3   : > { %v2473_v27 = vmul.f32 %v2425_v15, %v4424_v32  ;;  %v2644_v19 = vsel %vm1288_vm2, %v2566_v34, %v2557_v8 }
 0x5c4   : > { %v2599_v0 = vrot.slane %v2598_v48, 2  ;;  %v2645_v5 = vsel %vm1291_vm3, %v2575_v39, %v2644_v19 }
 0x5c5   : > { %v2603_v55 = vsel %vm668_vm0, %v2473_v27, 0.0  ;;  %v2646_v32 = vsel %vm1294_vm4, %v2584_v53, %v2645_v5 }
 0x5c6   : > { %v2605_v7 = vadd.f32 %v2604_v52, %v2603_v55  ;;  %v2600_v14 = vadd.f32 %v2599_v0, %v2598_v48  ;;  %v2647_v54 = vsel %vm1297_vm5, %v2593_v4, %v2646_v32 }
 0x5c8   : > { %v2606_v12 = vrot.slane %v2605_v7, 4  ;;  %v2601_v61 = vrot.slane %v2600_v14, 1 }
 0x5ca   : > { %v2607_v20 = vadd.f32 %v2606_v12, %v2605_v7  ;;  %v2602_v27 = vadd.f32 %v2601_v61, %v2600_v14 }
 0x5cc   : > { %v2608_v2 = vrot.slane %v2607_v20, 2  ;;  %v2648_v55 = vsel %vm1300_vm6, %v2602_v27, %v2647_v54 }
 0x5ce   : > { %v2609_v21 = vadd.f32 %v2608_v2, %v2607_v20 }
 0x5d0   : > { %v2610_v17 = vrot.slane %v2609_v21, 1 }
 0x5d2   : > { %v2444_v25 = vpop.permute.xlu1 %2443  ;;  %v2611_v28 = vadd.f32 %v2610_v17, %v2609_v21 }
 0x5d3   : > { %v2476_v57 = vmul.f32 %v2444_v25, %v4427_v46 }
 0x5d4   : > { %v2649_v52 = vsel %vm1303_vm7, %v2611_v28, %v2648_v55 }
 0x5d5   : > { %v2613_v9 = vsel %vm668_vm0, %v2476_v57, 0.0 }
 0x5d6   : > { %v2614_v50 = vadd.f32 %v2613_v9, %v2612_v36 }
 0x5d8   : > { %v2615_v63 = vrot.slane %v2614_v50, 4 }
 0x5da   : > { %v2616_v40 = vadd.f32 %v2615_v63, %v2614_v50 }
 0x5dc   : > { %v2617_v15 = vrot.slane %v2616_v40, 2 }
 0x5de   : > { %v2618_v47 = vadd.f32 %v2617_v15, %v2616_v40 }
 0x5e0   : > { %v2619_v30 = vrot.slane %v2618_v47, 1 }
 0x5e2   : > { %v2620_v35 = vadd.f32 %v2619_v30, %v2618_v47 }
 0x5e4   : > { %v2650_v62 = vsel %vm2199_vm10, %v2620_v35, %v2649_v52 }
 0x5e5   : > { %2654 = vst.msk [vmem:[%s4198_s29 + $0x8] sm:$0xff] %vm668_vm0, %v2650_v62 }
 0x5e6 PF: > { %s25_s23 = sadd.s32 1, %s3126_s23  }
 0x5e7   : > { %p22_p5 = scmp.ge.s32.totalorder %s25_s23, 6  }
 0x5e9   :  { %24 = sbr.rel (!%p22_p5) target bundleno = 3 (0x3), region = 112 }

</bundles_post_ra>
